<compile_context>
chip_gen: v7x
topology: tpu7x:2x2x1
jax: 0.10.0
libtpu: 0.0.40
codegen_flags: <defaults>
</compile_context>

<pallas_src>
import functools

import jax
import jax.numpy as jnp
from jax.experimental import pallas as pl
from jax.experimental.pallas import tpu as pltpu


def _round_up(n, m):
    return ((n + m - 1) // m) * m


def _mlp_kernel(output_size,
                x_ref,
                w1_ref, b1_ref,
                w2_ref, b2_ref,
                w3_ref, b3_ref,
                w4_ref, b4_ref,
                wr_ref, br_ref,
                out_ref):
    """One batch tile of the whole forward pass (weights are VMEM-resident blocks)."""
    cdt = w1_ref.dtype  # compute dtype for MXU operands (bf16 by default)

    x = x_ref[...]

    # Layer 1: Linear(in_channels, 64) + ReLU   (f32 accumulate, f32 bias/ReLU)
    h = jnp.dot(x, w1_ref[...], preferred_element_type=jnp.float32) + b1_ref[...]
    h = jnp.maximum(h, 0.0)

    # Layer 2: Linear(64, 64) + ReLU
    h = jnp.dot(h.astype(cdt), w2_ref[...], preferred_element_type=jnp.float32) + b2_ref[...]
    h = jnp.maximum(h, 0.0)

    # Layer 3: Linear(64, 64) + ReLU
    h = jnp.dot(h.astype(cdt), w3_ref[...], preferred_element_type=jnp.float32) + b3_ref[...]
    h = jnp.maximum(h, 0.0)

    # Layer 4: Linear(64, output_size) + ReLU  (w4/b4 zero-padded to lane-dense width,
    # so the padded columns of h are exactly 0 after ReLU)
    h = jnp.dot(h.astype(cdt), w4_ref[...], preferred_element_type=jnp.float32) + b4_ref[...]
    h = jnp.maximum(h, 0.0)  # [TILE_B, OUT_PAD] f32

    # Regression head Linear(output_size, 1): VPU multiply + lane reduce; the zero-padded
    # h columns contribute nothing. Avoids a [TILE_B,16]@[16,1] MXU pass for one lane.
    y = jnp.sum(h * wr_ref[...], axis=-1, keepdims=True) + br_ref[...]  # [TILE_B, 1] f32

    # Pack y into column `output_size` of the lane-dense output tile (single full-lane store).
    col = jax.lax.broadcasted_iota(jnp.int32, h.shape, 1)
    out_ref[...] = jnp.where(col == output_size, y, h).astype(out_ref.dtype)


def device_model_no_rnn(x, params, *, tile_b=256, compute_dtype=jnp.bfloat16):
    """x [B, in_channels] -> (h [B, output_size], y [B, 1]). Matches PyTorch forward."""
    B, in_channels = x.shape
    output_size = params["w4"].shape[1]

    out_pad = _round_up(output_size + 1, 128)   # room for h (output_size cols) + y (1 col)
    b_pad = _round_up(max(B, 1), tile_b)

    # Pad batch to a tile multiple; padded rows are garbage and sliced off below.
    xp = x if b_pad == B else jnp.pad(x, ((0, b_pad - B), (0, 0)))
    xp = xp.astype(compute_dtype)

    # MXU operands in compute dtype; biases stay f32 (VPU math stays f32).
    w1 = params["w1"].astype(compute_dtype)
    w2 = params["w2"].astype(compute_dtype)
    w3 = params["w3"].astype(compute_dtype)
    w4 = jnp.pad(params["w4"], ((0, 0), (0, out_pad - output_size))).astype(compute_dtype)
    b1, b2, b3 = params["b1"], params["b2"], params["b3"]
    b4 = jnp.pad(params["b4"], ((0, 0), (0, out_pad - output_size)))
    # Regression weight as a zero-padded f32 row for the VPU multiply-reduce.
    wr_row = jnp.pad(params["wr"].reshape(1, output_size),
                     ((0, 0), (0, out_pad - output_size)))
    br = params["br"].reshape(1, 1)

    grid = (pl.cdiv(b_pad, tile_b),)
    const2 = lambda i: (0, 0)   # weights/biases: same block every step -> VMEM-resident

    in_specs = [
        pl.BlockSpec((tile_b, in_channels), lambda i: (i, 0)),   # x, batch-tiled
        pl.BlockSpec(w1.shape, const2), pl.BlockSpec(b1.shape, const2),
        pl.BlockSpec(w2.shape, const2), pl.BlockSpec(b2.shape, const2),
        pl.BlockSpec(w3.shape, const2), pl.BlockSpec(b3.shape, const2),
        pl.BlockSpec(w4.shape, const2), pl.BlockSpec(b4.shape, const2),
        pl.BlockSpec(wr_row.shape, const2), pl.BlockSpec(br.shape, const2),
    ]
    out_specs = pl.BlockSpec((tile_b, out_pad), lambda i: (i, 0))

    out = pl.pallas_call(
        functools.partial(_mlp_kernel, output_size),
        grid=grid,
        in_specs=in_specs,
        out_specs=out_specs,
        out_shape=jax.ShapeDtypeStruct((b_pad, out_pad), jnp.float32),
        compiler_params=pltpu.CompilerParams(
            dimension_semantics=("parallel",)),   # megacore sharding on v7x
    )(xp, w1, b1, w2, b2, w3, b3, w4, b4, wr_row, br)

    h = out[:B, :output_size]
    y = out[:B, output_size:output_size + 1]
    return h, y


def init_params(key, in_channels, output_size):
    """Deterministic synthetic parameters.

    PyTorch nn.Linear stores weight as [out, in]; we store the transpose [in, out]
    so the kernel does x @ W directly. Biases are [1, out]; regression weight is
    [output_size, 1], regression bias is [1, 1].
    """
    dims = [(in_channels, 64), (64, 64), (64, 64), (64, output_size), (output_size, 1)]
    names = ["1", "2", "3", "4", "r"]
    params = {}
    for name, (din, dout) in zip(names, dims):
        key, kw, kb = jax.random.split(key, 3)
        bound = 1.0 / jnp.sqrt(float(din))  # torch Linear default U(-1/sqrt(in), 1/sqrt(in))
        params[f"w{name}"] = jax.random.uniform(kw, (din, dout), jnp.float32, -bound, bound)
        params[f"b{name}"] = jax.random.uniform(kb, (1, dout), jnp.float32, -bound, bound)
    return params


def _reference(x, params, compute_dtype=jnp.bfloat16):
    """Pure-JAX reference mirroring the kernel math (bf16 matmul operands, f32 accum)."""
    h = x.astype(compute_dtype)
    for name in ["1", "2", "3", "4"]:
        w = params[f"w{name}"].astype(compute_dtype)
        h = jnp.dot(h, w, preferred_element_type=jnp.float32) + params[f"b{name}"]
        h = jnp.maximum(h, 0.0)
        if name != "4":
            h = h.astype(compute_dtype)
    y = jnp.sum(h * params["wr"][:, 0], axis=-1, keepdims=True) + params["br"]
    return h, y


if __name__ == "__main__":
    in_channels = 32
    output_size = 16
    batch = 8

    key = jax.random.PRNGKey(0)
    kx, kp = jax.random.split(key)
    x = jax.random.normal(kx, (batch, in_channels), jnp.float32)
    params = init_params(kp, in_channels, output_size)

    h, y = device_model_no_rnn(x, params)
    jax.block_until_ready((h, y))

    h_ref, y_ref = _reference(x, params)
    assert h.shape == (batch, output_size) and y.shape == (batch, 1)
    assert jnp.allclose(h, h_ref, atol=1e-3, rtol=1e-3), float(jnp.max(jnp.abs(h - h_ref)))
    assert jnp.allclose(y, y_ref, atol=1e-3, rtol=1e-3), float(jnp.max(jnp.abs(y - y_ref)))

    print("KERNEL_OK")
</pallas_src>

<mosaic_0001>
module attributes {stable_mosaic.version = 11 : i64} {
  func.func @_mlp_kernel(%arg0: i32, %arg1: memref<256x32xbf16, #tpu.memory_space<vmem>>, %arg2: memref<32x64xbf16, #tpu.memory_space<vmem>>, %arg3: memref<1x64xf32, #tpu.memory_space<vmem>>, %arg4: memref<64x64xbf16, #tpu.memory_space<vmem>>, %arg5: memref<1x64xf32, #tpu.memory_space<vmem>>, %arg6: memref<64x64xbf16, #tpu.memory_space<vmem>>, %arg7: memref<1x64xf32, #tpu.memory_space<vmem>>, %arg8: memref<64x128xbf16, #tpu.memory_space<vmem>>, %arg9: memref<1x128xf32, #tpu.memory_space<vmem>>, %arg10: memref<1x128xf32, #tpu.memory_space<vmem>>, %arg11: memref<1x1xf32, #tpu.memory_space<vmem>>, %arg12: memref<256x128xf32, #tpu.memory_space<vmem>>) attributes {dimension_semantics = [#tpu.dimension_semantics<parallel>], iteration_bounds = array<i64: 1>, scalar_prefetch = 0 : i64, scratch_operands = 0 : i64, tpu.core_type = #tpu.core_type<tc>, window_params = [{transform_indices = @transform_0, window_bounds = array<i64: 256, 32>}, {pipeline_mode = #tpu.pipeline_mode<synchronous>, transform_indices = @transform_1, window_bounds = array<i64: 32, 64>}, {pipeline_mode = #tpu.pipeline_mode<synchronous>, transform_indices = @transform_2, window_bounds = array<i64: 1, 64>}, {pipeline_mode = #tpu.pipeline_mode<synchronous>, transform_indices = @transform_3, window_bounds = array<i64: 64, 64>}, {pipeline_mode = #tpu.pipeline_mode<synchronous>, transform_indices = @transform_4, window_bounds = array<i64: 1, 64>}, {pipeline_mode = #tpu.pipeline_mode<synchronous>, transform_indices = @transform_5, window_bounds = array<i64: 64, 64>}, {pipeline_mode = #tpu.pipeline_mode<synchronous>, transform_indices = @transform_6, window_bounds = array<i64: 1, 64>}, {pipeline_mode = #tpu.pipeline_mode<synchronous>, transform_indices = @transform_7, window_bounds = array<i64: 64, 128>}, {pipeline_mode = #tpu.pipeline_mode<synchronous>, transform_indices = @transform_8, window_bounds = array<i64: 1, 128>}, {pipeline_mode = #tpu.pipeline_mode<synchronous>, transform_indices = @transform_9, window_bounds = array<i64: 1, 128>}, {pipeline_mode = #tpu.pipeline_mode<synchronous>, transform_indices = @transform_10, window_bounds = array<i64: 1, 1>}, {transform_indices = @transform_11, window_bounds = array<i64: 256, 128>}]} {
    %c0 = arith.constant 0 : index
    %c0_0 = arith.constant 0 : index
    %0 = vector.load %arg1[%c0, %c0_0] : memref<256x32xbf16, #tpu.memory_space<vmem>>, vector<256x32xbf16>
    %c0_1 = arith.constant 0 : index
    %c0_2 = arith.constant 0 : index
    %1 = vector.load %arg2[%c0_1, %c0_2] : memref<32x64xbf16, #tpu.memory_space<vmem>>, vector<32x64xbf16>
    %cst = arith.constant dense<0.000000e+00> : vector<256x64xf32>
    %2 = tpu.matmul %0, %1, %cst {dimension_numbers = #tpu.dot_dimension_numbers<[1], [0], [0], [1], [0, 0, 1, 1], [], []>} : vector<256x32xbf16>, vector<32x64xbf16>, vector<256x64xf32> -> vector<256x64xf32>
    %c0_3 = arith.constant 0 : index
    %c0_4 = arith.constant 0 : index
    %3 = vector.load %arg3[%c0_3, %c0_4] : memref<1x64xf32, #tpu.memory_space<vmem>>, vector<1x64xf32>
    %4 = vector.broadcast %3 : vector<1x64xf32> to vector<256x64xf32>
    %5 = arith.addf %2, %4 : vector<256x64xf32>
    %cst_5 = arith.constant 0.000000e+00 : f32
    %6 = vector.broadcast %cst_5 : f32 to vector<256x64xf32>
    %7 = arith.maximumf %5, %6 : vector<256x64xf32>
    %8 = arith.truncf %7 : vector<256x64xf32> to vector<256x64xbf16>
    %c0_6 = arith.constant 0 : index
    %c0_7 = arith.constant 0 : index
    %9 = vector.load %arg4[%c0_6, %c0_7] : memref<64x64xbf16, #tpu.memory_space<vmem>>, vector<64x64xbf16>
    %cst_8 = arith.constant dense<0.000000e+00> : vector<256x64xf32>
    %10 = tpu.matmul %8, %9, %cst_8 {dimension_numbers = #tpu.dot_dimension_numbers<[1], [0], [0], [1], [0, 0, 1, 1], [], []>} : vector<256x64xbf16>, vector<64x64xbf16>, vector<256x64xf32> -> vector<256x64xf32>
    %c0_9 = arith.constant 0 : index
    %c0_10 = arith.constant 0 : index
    %11 = vector.load %arg5[%c0_9, %c0_10] : memref<1x64xf32, #tpu.memory_space<vmem>>, vector<1x64xf32>
    %12 = vector.broadcast %11 : vector<1x64xf32> to vector<256x64xf32>
    %13 = arith.addf %10, %12 : vector<256x64xf32>
    %cst_11 = arith.constant 0.000000e+00 : f32
    %14 = vector.broadcast %cst_11 : f32 to vector<256x64xf32>
    %15 = arith.maximumf %13, %14 : vector<256x64xf32>
    %16 = arith.truncf %15 : vector<256x64xf32> to vector<256x64xbf16>
    %c0_12 = arith.constant 0 : index
    %c0_13 = arith.constant 0 : index
    %17 = vector.load %arg6[%c0_12, %c0_13] : memref<64x64xbf16, #tpu.memory_space<vmem>>, vector<64x64xbf16>
    %cst_14 = arith.constant dense<0.000000e+00> : vector<256x64xf32>
    %18 = tpu.matmul %16, %17, %cst_14 {dimension_numbers = #tpu.dot_dimension_numbers<[1], [0], [0], [1], [0, 0, 1, 1], [], []>} : vector<256x64xbf16>, vector<64x64xbf16>, vector<256x64xf32> -> vector<256x64xf32>
    %c0_15 = arith.constant 0 : index
    %c0_16 = arith.constant 0 : index
    %19 = vector.load %arg7[%c0_15, %c0_16] : memref<1x64xf32, #tpu.memory_space<vmem>>, vector<1x64xf32>
    %20 = vector.broadcast %19 : vector<1x64xf32> to vector<256x64xf32>
    %21 = arith.addf %18, %20 : vector<256x64xf32>
    %cst_17 = arith.constant 0.000000e+00 : f32
    %22 = vector.broadcast %cst_17 : f32 to vector<256x64xf32>
    %23 = arith.maximumf %21, %22 : vector<256x64xf32>
    %24 = arith.truncf %23 : vector<256x64xf32> to vector<256x64xbf16>
    %c0_18 = arith.constant 0 : index
    %c0_19 = arith.constant 0 : index
    %25 = vector.load %arg8[%c0_18, %c0_19] : memref<64x128xbf16, #tpu.memory_space<vmem>>, vector<64x128xbf16>
    %cst_20 = arith.constant dense<0.000000e+00> : vector<256x128xf32>
    %26 = tpu.matmul %24, %25, %cst_20 {dimension_numbers = #tpu.dot_dimension_numbers<[1], [0], [0], [1], [0, 0, 1, 1], [], []>} : vector<256x64xbf16>, vector<64x128xbf16>, vector<256x128xf32> -> vector<256x128xf32>
    %c0_21 = arith.constant 0 : index
    %c0_22 = arith.constant 0 : index
    %27 = vector.load %arg9[%c0_21, %c0_22] : memref<1x128xf32, #tpu.memory_space<vmem>>, vector<1x128xf32>
    %28 = vector.broadcast %27 : vector<1x128xf32> to vector<256x128xf32>
    %29 = arith.addf %26, %28 : vector<256x128xf32>
    %cst_23 = arith.constant 0.000000e+00 : f32
    %30 = vector.broadcast %cst_23 : f32 to vector<256x128xf32>
    %31 = arith.maximumf %29, %30 : vector<256x128xf32>
    %c0_24 = arith.constant 0 : index
    %c0_25 = arith.constant 0 : index
    %32 = vector.load %arg10[%c0_24, %c0_25] : memref<1x128xf32, #tpu.memory_space<vmem>>, vector<1x128xf32>
    %33 = vector.broadcast %32 : vector<1x128xf32> to vector<256x128xf32>
    %34 = arith.mulf %31, %33 : vector<256x128xf32>
    %cst_26 = arith.constant dense<0.000000e+00> : vector<256xf32>
    %35 = vector.multi_reduction <add>, %34, %cst_26 [1] : vector<256x128xf32> to vector<256xf32>
    %36 = vector.shape_cast %35 : vector<256xf32> to vector<256x1xf32>
    %c0_27 = arith.constant 0 : index
    %c0_28 = arith.constant 0 : index
    %37 = vector.load %arg11[%c0_27, %c0_28] : memref<1x1xf32, #tpu.memory_space<vmem>>, vector<1x1xf32>
    %38 = vector.broadcast %37 : vector<1x1xf32> to vector<256x1xf32>
    %39 = arith.addf %36, %38 : vector<256x1xf32>
    %40 = tpu.iota {dimensions = array<i32: 1>} : vector<256x128xi32>
    %c16_i32 = arith.constant 16 : i32
    %41 = vector.broadcast %c16_i32 : i32 to vector<256x128xi32>
    %42 = arith.cmpi eq, %40, %41 : vector<256x128xi32>
    %43 = vector.shape_cast %39 : vector<256x1xf32> to vector<256x1xf32>
    %44 = vector.broadcast %43 : vector<256x1xf32> to vector<256x128xf32>
    %45 = arith.select %42, %44, %31 : vector<256x128xi1>, vector<256x128xf32>
    %c0_29 = arith.constant 0 : index
    %c0_30 = arith.constant 0 : index
    %46 = vector.load %arg12[%c0_29, %c0_30] : memref<256x128xf32, #tpu.memory_space<vmem>>, vector<256x128xf32>
    tpu.vector_store %arg12[%c0_29, %c0_30], %45 {strides = array<i32>} : memref<256x128xf32, #tpu.memory_space<vmem>>, vector<256x128xf32>,
    return
  }
  func.func @transform_0(%arg0: i32) -> (i32, i32) {
    %c0_i32 = arith.constant 0 : i32
    %c0_i32_0 = arith.constant 0 : i32
    return %arg0, %c0_i32 : i32, i32
  }
  func.func @transform_1(%arg0: i32) -> (i32, i32) {
    %c0_i32 = arith.constant 0 : i32
    %c0_i32_0 = arith.constant 0 : i32
    %c0_i32_1 = arith.constant 0 : i32
    return %c0_i32, %c0_i32_0 : i32, i32
  }
  func.func @transform_2(%arg0: i32) -> (i32, i32) {
    %c0_i32 = arith.constant 0 : i32
    %c0_i32_0 = arith.constant 0 : i32
    %c0_i32_1 = arith.constant 0 : i32
    return %c0_i32, %c0_i32_0 : i32, i32
  }
  func.func @transform_3(%arg0: i32) -> (i32, i32) {
    %c0_i32 = arith.constant 0 : i32
    %c0_i32_0 = arith.constant 0 : i32
    %c0_i32_1 = arith.constant 0 : i32
    return %c0_i32, %c0_i32_0 : i32, i32
  }
  func.func @transform_4(%arg0: i32) -> (i32, i32) {
    %c0_i32 = arith.constant 0 : i32
    %c0_i32_0 = arith.constant 0 : i32
    %c0_i32_1 = arith.constant 0 : i32
    return %c0_i32, %c0_i32_0 : i32, i32
  }
  func.func @transform_5(%arg0: i32) -> (i32, i32) {
    %c0_i32 = arith.constant 0 : i32
    %c0_i32_0 = arith.constant 0 : i32
    %c0_i32_1 = arith.constant 0 : i32
    return %c0_i32, %c0_i32_0 : i32, i32
  }
  func.func @transform_6(%arg0: i32) -> (i32, i32) {
    %c0_i32 = arith.constant 0 : i32
    %c0_i32_0 = arith.constant 0 : i32
    %c0_i32_1 = arith.constant 0 : i32
    return %c0_i32, %c0_i32_0 : i32, i32
  }
  func.func @transform_7(%arg0: i32) -> (i32, i32) {
    %c0_i32 = arith.constant 0 : i32
    %c0_i32_0 = arith.constant 0 : i32
    %c0_i32_1 = arith.constant 0 : i32
    return %c0_i32, %c0_i32_0 : i32, i32
  }
  func.func @transform_8(%arg0: i32) -> (i32, i32) {
    %c0_i32 = arith.constant 0 : i32
    %c0_i32_0 = arith.constant 0 : i32
    %c0_i32_1 = arith.constant 0 : i32
    return %c0_i32, %c0_i32_0 : i32, i32
  }
  func.func @transform_9(%arg0: i32) -> (i32, i32) {
    %c0_i32 = arith.constant 0 : i32
    %c0_i32_0 = arith.constant 0 : i32
    %c0_i32_1 = arith.constant 0 : i32
    return %c0_i32, %c0_i32_0 : i32, i32
  }
  func.func @transform_10(%arg0: i32) -> (i32, i32) {
    %c0_i32 = arith.constant 0 : i32
    %c0_i32_0 = arith.constant 0 : i32
    %c0_i32_1 = arith.constant 0 : i32
    return %c0_i32, %c0_i32_0 : i32, i32
  }
  func.func @transform_11(%arg0: i32) -> (i32, i32) {
    %c0_i32 = arith.constant 0 : i32
    %c0_i32_0 = arith.constant 0 : i32
    return %arg0, %c0_i32 : i32, i32
  }
}

</mosaic_0001>

<bundles_post_ra>
// kernel: tpu_custom_call.1
= control target key start
LH: loop header
LB: loop body
LE: loop exit
PB: predicated region body
PF: predicated region fallthrough
CT: control target
= control target key end

     0   :  { %s2830_s0 = inlined_call_operand.vmem [shape: bf16[256,32], index: 0, kind: input, shape index: {}]   ;;  %s2831_s1 = inlined_call_operand.vmem [shape: bf16[32,64], index: 1, kind: input, shape index: {}]   ;;  %s2832_s2 = inlined_call_operand.vmem [shape: f32[1,64], index: 2, kind: input, shape index: {}]   ;;  %s2833_s3 = inlined_call_operand.vmem [shape: bf16[64,64], index: 3, kind: input, shape index: {}]   ;;  %s2834_s4 = inlined_call_operand.vmem [shape: f32[1,64], index: 4, kind: input, shape index: {}]   ;;  %s2835_s5 = inlined_call_operand.vmem [shape: bf16[64,64], index: 5, kind: input, shape index: {}]   ;;  %s2836_s6 = inlined_call_operand.vmem [shape: f32[1,64], index: 6, kind: input, shape index: {}]   ;;  %s2837_s7 = inlined_call_operand.vmem [shape: bf16[64,128], index: 7, kind: input, shape index: {}]   ;;  %s2838_s8 = inlined_call_operand.vmem [shape: f32[1,128], index: 8, kind: input, shape index: {}]   ;;  %s2839_s9 = inlined_call_operand.vmem [shape: f32[1,128], index: 9, kind: input, shape index: {}]   ;;  %s2840_s10 = inlined_call_operand.<no memory space> [shape: f32[1,1], index: 10, kind: input, shape index: {}]   ;;  %s2841_s11 = inlined_call_operand.hbm [shape: f32[256,128], index: 11, kind: output, shape index: {}]  }
   0x1   :  { %v16_v0 = vstv %s2840_s10 }
   0x2   :  { %17 = vst [vmem:[#allocation2] sm:$0x1] %v16_v0 }
   0x3   :  { %v2033_v1 = vld [vmem:[%s2831_s1] sm:$0xff]   ;;  %v2034_v2 = vld [vmem:[%s2831_s1 + $0x8] sm:$0xff]   ;;  %vm177_vm0 = vcmask 261120   ;;  %v2037_v5 = vld [vmem:[%s2830_s0 + $0x10] sm:$0xff]  }
   0x4   :  { %1871 = vmatprep.subr.bf16.mxu0 %v2033_v1  ;;  %v2035_v3 = vld [vmem:[%s2830_s0] sm:$0xff]   ;;  %v2036_v4 = vld [vmem:[%s2830_s0 + $0x8] sm:$0xff]   ;;  %v2038_v6 = vld [vmem:[%s2830_s0 + $0x18] sm:$0xff]  }
   0x5   :  { %1872 = vmatpush3.bf16.msra.mxu0 %v2033_v1  ;;  %1875 = vmatprep.mubr.msk.bf16.mxu0 %vm177_vm0, %v2035_v3  ;;  %v2039_v7 = vld [vmem:[%s2830_s0 + $0x20] sm:$0xff]   ;;  %v2052_v9 = vld [vmem:[%s2833_s3 + $0x8] sm:$0xff]   ;;  %v2041_v11 = vld [vmem:[%s2830_s0 + $0x30] sm:$0xff]  }
   0x6   :  { %1873 = vmatprep.subr.bf16.mxu0 %v2034_v2  ;;  %v2051_v8 = vld [vmem:[%s2833_s3] sm:$0xff]   ;;  %v2040_v10 = vld [vmem:[%s2830_s0 + $0x28] sm:$0xff]  }
   0x7   :  { %1907 = vmatprep.subr.bf16.mxu1 %v2051_v8 }
   0x8   :  { %1908 = vmatpush3.bf16.msra.mxu1 %v2051_v8 }
   0x9   :  { %1874 = vmatpush3.bf16.msra.mxu0 %v2034_v2  ;;  %1909 = vmatprep.subr.bf16.mxu1 %v2052_v9 }
   0xc   :  { %1876 = vmatmul.mubr.msk.bf16.vlgmr.msra.gmra.mrb[0].mxu0 %vm177_vm0, %v2036_v4  ;;  %1910 = vmatpush3.bf16.msra.mxu1 %v2052_v9 }
   0xd   :  { %1879 = vmatprep.mubr.msk.bf16.mxu0 %vm177_vm0, %v2037_v5 }
  0x14   :  { %1880 = vmatmul.mubr.msk.bf16.gmra.mrb[4].mxu0 %vm177_vm0, %v2038_v6 }
  0x15   :  { %1883 = vmatprep.mubr.msk.bf16.mxu0 %vm177_vm0, %v2039_v7 }
  0x1c   :  { %1884 = vmatmul.mubr.msk.bf16.gmra.mrb[8].mxu0 %vm177_vm0, %v2040_v10 }
  0x1d   :  { %18 = vsyncpa [#allocation4], 0  ;;  %1887 = vmatprep.mubr.msk.bf16.mxu0 %vm177_vm0, %v2041_v11  ;;  %v2042_v12 = vld [vmem:[%s2830_s0 + $0x38] sm:$0xff]   ;;  %v2043_v13 = vld [vmem:[%s2830_s0 + $0x40] sm:$0xff]   ;;  %vm474_vm1 = vcmask 523264  }
  0x1e   :  { %v2044_v14 = vld [vmem:[%s2830_s0 + $0x48] sm:$0xff]   ;;  %v2045_v15 = vld [vmem:[%s2830_s0 + $0x50] sm:$0xff]   ;;  %v2046_v16 = vld [vmem:[%s2830_s0 + $0x58] sm:$0xff]  }
  0x1f   :  { %v2047_v17 = vld [vmem:[%s2830_s0 + $0x60] sm:$0xff]   ;;  %v2048_v18 = vld [vmem:[%s2830_s0 + $0x68] sm:$0xff]   ;;  %v2049_v19 = vld [vmem:[%s2830_s0 + $0x70] sm:$0xff]  }
  0x20   :  { %v2050_v20 = vld [vmem:[%s2830_s0 + $0x78] sm:$0xff]   ;;  %v2053_v21 = vld [vmem:[%s2833_s3 + $0x10] sm:$0xff]   ;;  %v2055_v23 = vld [vmem:[%s2835_s5] sm:$0xff]  }
  0x21   :  { %1911 = vmatprep.subr.bf16.mxu1 %v2053_v21  ;;  %v2054_v22 = vld [vmem:[%s2833_s3 + $0x18] sm:$0xff]   ;;  %v2056_v24 = vld [vmem:[%s2835_s5 + $0x8] sm:$0xff]   ;;  %1947 = vmatprep.subr.bf16.mxu0 %v2055_v23  ;;  %v2057_v25 = vld [vmem:[%s2835_s5 + $0x10] sm:$0xff]  }
  0x22   :  { %1912 = vmatpush3.bf16.msra.mxu1 %v2053_v21  ;;  %1948 = vmatpush3.bf16.msra.mxu0 %v2055_v23  ;;  %v2058_v26 = vld [vmem:[%s2835_s5 + $0x18] sm:$0xff]   ;;  %v2251_v27 = vld [vmem:[%s2832_s2] ss:$0 sm:$0xff] }
  0x23   :  { %1913 = vmatprep.subr.bf16.mxu1 %v2054_v22  ;;  %1949 = vmatprep.subr.bf16.mxu0 %v2056_v24 }
  0x24   :  { %1888 = vmatmul.mubr.msk.bf16.gmra.mrb[12].mxu0 %vm177_vm0, %v2042_v12 }
  0x25   :  { %1891 = vmatprep.mubr.msk.bf16.mxu0 %vm177_vm0, %v2043_v13 }
  0x26   :  { %1914 = vmatpush3.bf16.msra.mxu1 %v2054_v22  ;;  %1950 = vmatpush3.bf16.msra.mxu0 %v2056_v24 }
  0x27   :  { %1951 = vmatprep.subr.bf16.mxu0 %v2057_v25 }
  0x2a   :  { %1952 = vmatpush3.bf16.msra.mxu0 %v2057_v25 }
  0x2b   :  { %1953 = vmatprep.subr.bf16.mxu0 %v2058_v26 }
  0x2c   :  { %1892 = vmatmul.mubr.msk.bf16.gmra.mrb[16].mxu0 %vm177_vm0, %v2044_v14 }
  0x2d   :  { %1895 = vmatprep.mubr.msk.bf16.mxu0 %vm177_vm0, %v2045_v15 }
  0x2e   :  { %1954 = vmatpush3.bf16.msra.mxu0 %v2058_v26 }
  0x34   :  { %1896 = vmatmul.mubr.msk.bf16.gmra.mrb[20].mxu0 %vm177_vm0, %v2046_v16 }
  0x35   :  { %1899 = vmatprep.mubr.msk.bf16.mxu0 %vm177_vm0, %v2047_v17 }
  0x3c   :  { %1900 = vmatmul.mubr.msk.bf16.gmra.mrb[24].mxu0 %vm177_vm0, %v2048_v18 }
  0x3d   :  { %1903 = vmatprep.mubr.msk.bf16.mxu0 %vm177_vm0, %v2049_v19 }
  0x44   :  { %1904 = vmatmul.mubr.msk.bf16.gmra.mrb[28].mxu0 %vm177_vm0, %v2050_v20 }
  0xdf   :  { %v1877_v28 = vpop.f32.mrb[0].mxu0 }
  0xe0   :  { %v269_v29 = vadd.f32 %v1877_v28, %v2251_v27  ;;  %v260_v30 = vpop.f32.mrb[1].mxu0 }
  0xe1   :  { %v261_v31 = vadd.f32 %v2251_v27, %v260_v30  ;;  %v1878_v32 = vpop.f32.mrb[2].mxu0 }
  0xe2   :  { %v272_v33 = vadd.f32 %v1878_v32, %v2251_v27  ;;  %v263_v34 = vpop.f32.mrb[3].mxu0  ;;  %v389_v36 = vmax.f32 %v269_v29, 0.0 }
  0xe3   :  { %v264_v35 = vadd.f32 %v2251_v27, %v263_v34  ;;  %v387_v38 = vmax.f32 %v261_v31, 0.0 }
  0xe4   :  { %v390_v37 = vmax.f32 %v272_v33, 0.0 }
  0xe5   :  { %v388_v39 = vmax.f32 %v264_v35, 0.0 }
  0xe6   :  { %v420_v40 = vpack.c.bf16 %v390_v37, %v389_v36 }
  0xe7   :  { %v1881_v41 = vpop.f32.mrb[4].mxu0  ;;  %v419_v42 = vpack.c.bf16 %v388_v39, %v387_v38 }
  0xe8   :  { %v285_v43 = vadd.f32 %v1881_v41, %v2251_v27  ;;  %v276_v44 = vpop.f32.mrb[5].mxu0 }
  0xe9   :  { %v277_v45 = vadd.f32 %v2251_v27, %v276_v44  ;;  %v1882_v46 = vpop.f32.mrb[6].mxu0  ;;  %1915 = vmatprep.mubr.msk.bf16.mxu1 %vm474_vm1, %v419_v42 }
  0xea   :  { %v393_v47 = vmax.f32 %v285_v43, 0.0  ;;  %v288_v48 = vadd.f32 %v1882_v46, %v2251_v27  ;;  %v279_v49 = vpop.f32.mrb[7].mxu0  ;;  %1916 = vmatmul.mubr.msk.bf16.vlgmr.msra.gmra.mrb[0].mxu1 %vm474_vm1, %v420_v40 }
  0xeb   :  { %v391_v50 = vmax.f32 %v277_v45, 0.0  ;;  %v280_v51 = vadd.f32 %v2251_v27, %v279_v49 }
  0xec   :  { %v394_v52 = vmax.f32 %v288_v48, 0.0 }
  0xed   :  { %v392_v53 = vmax.f32 %v280_v51, 0.0 }
  0xee   :  { %v422_v54 = vpack.c.bf16 %v394_v52, %v393_v47 }
  0xef   :  { %v421_v55 = vpack.c.bf16 %v392_v53, %v391_v50  ;;  %v1885_v56 = vpop.f32.mrb[8].mxu0 }
  0xf0   :  { %v301_v57 = vadd.f32 %v1885_v56, %v2251_v27  ;;  %v292_v58 = vpop.f32.mrb[9].mxu0 }
  0xf1   :  { %v293_v59 = vadd.f32 %v2251_v27, %v292_v58  ;;  %v1886_v60 = vpop.f32.mrb[10].mxu0  ;;  %1919 = vmatprep.mubr.msk.bf16.mxu1 %vm474_vm1, %v421_v55 }
  0xf2   :  { %v397_v61 = vmax.f32 %v301_v57, 0.0  ;;  %v304_v62 = vadd.f32 %v1886_v60, %v2251_v27  ;;  %v295_v63 = vpop.f32.mrb[11].mxu0  ;;  %1920 = vmatmul.mubr.msk.bf16.gmra.mrb[4].mxu1 %vm474_vm1, %v422_v54 }
  0xf3   :  { %v395_v0 = vmax.f32 %v293_v59, 0.0  ;;  %v296_v1 = vadd.f32 %v2251_v27, %v295_v63 }
  0xf4   :  { %v398_v2 = vmax.f32 %v304_v62, 0.0 }
  0xf5   :  { %v396_v3 = vmax.f32 %v296_v1, 0.0 }
  0xf6   :  { %v424_v4 = vpack.c.bf16 %v398_v2, %v397_v61 }
  0xf7   :  { %v423_v5 = vpack.c.bf16 %v396_v3, %v395_v0  ;;  %v1889_v6 = vpop.f32.mrb[12].mxu0 }
  0xf8   :  { %v317_v7 = vadd.f32 %v1889_v6, %v2251_v27  ;;  %v308_v8 = vpop.f32.mrb[13].mxu0 }
  0xf9   :  { %v309_v9 = vadd.f32 %v2251_v27, %v308_v8  ;;  %v1890_v10 = vpop.f32.mrb[14].mxu0  ;;  %1923 = vmatprep.mubr.msk.bf16.mxu1 %vm474_vm1, %v423_v5 }
  0xfa   :  { %v401_v11 = vmax.f32 %v317_v7, 0.0  ;;  %v320_v12 = vadd.f32 %v1890_v10, %v2251_v27  ;;  %v311_v13 = vpop.f32.mrb[15].mxu0  ;;  %1924 = vmatmul.mubr.msk.bf16.gmra.mrb[8].mxu1 %vm474_vm1, %v424_v4 }
  0xfb   :  { %v399_v14 = vmax.f32 %v309_v9, 0.0  ;;  %v312_v15 = vadd.f32 %v2251_v27, %v311_v13  ;;  %v2059_v13 = vld [vmem:[%s2837_s7] sm:$0xff]  }
  0xfc   :  { %v402_v16 = vmax.f32 %v320_v12, 0.0  ;;  %1987 = vmatprep.subr.bf16.mxu1 %v2059_v13 }
  0xfd   :  { %v400_v17 = vmax.f32 %v312_v15, 0.0  ;;  %1988 = vmatpush3.bf16.msra.mxu1 %v2059_v13  ;;  %v2062_v15 = vld [vmem:[%s2837_s7 + $0x18] sm:$0xff]  }
  0xfe   :  { %v426_v18 = vpack.c.bf16 %v402_v16, %v401_v11  ;;  %v2316_v16 = vld [vmem:[%s2834_s4] ss:$0 sm:$0xff] }
  0xff   :  { %v425_v19 = vpack.c.bf16 %v400_v17, %v399_v14  ;;  %v1893_v20 = vpop.f32.mrb[16].mxu0  ;;  %v2060_v14 = vld [vmem:[%s2837_s7 + $0x8] sm:$0xff]  }
 0x100   :  { %v333_v21 = vadd.f32 %v1893_v20, %v2251_v27  ;;  %v324_v22 = vpop.f32.mrb[17].mxu0  ;;  %1989 = vmatprep.subr.bf16.mxu1 %v2060_v14 }
 0x101   :  { %v325_v23 = vadd.f32 %v2251_v27, %v324_v22  ;;  %v1894_v24 = vpop.f32.mrb[18].mxu0  ;;  %1927 = vmatprep.mubr.msk.bf16.mxu1 %vm474_vm1, %v425_v19  ;;  %1990 = vmatpush3.bf16.msra.mxu1 %v2060_v14 }
 0x102   :  { %v405_v25 = vmax.f32 %v333_v21, 0.0  ;;  %v336_v26 = vadd.f32 %v1894_v24, %v2251_v27  ;;  %v327_v28 = vpop.f32.mrb[19].mxu0  ;;  %1928 = vmatmul.mubr.msk.bf16.gmra.mrb[12].mxu1 %vm474_vm1, %v426_v18 }
 0x103   :  { %v403_v29 = vmax.f32 %v325_v23, 0.0  ;;  %v328_v30 = vadd.f32 %v2251_v27, %v327_v28 }
 0x104   :  { %v406_v31 = vmax.f32 %v336_v26, 0.0 }
 0x105   :  { %v404_v32 = vmax.f32 %v328_v30, 0.0 }
 0x106   :  { %v428_v33 = vpack.c.bf16 %v406_v31, %v405_v25 }
 0x107   :  { %v427_v34 = vpack.c.bf16 %v404_v32, %v403_v29  ;;  %v1897_v35 = vpop.f32.mrb[20].mxu0 }
 0x108   :  { %v349_v36 = vadd.f32 %v1897_v35, %v2251_v27  ;;  %v340_v37 = vpop.f32.mrb[21].mxu0 }
 0x109   :  { %v341_v38 = vadd.f32 %v2251_v27, %v340_v37  ;;  %v1898_v39 = vpop.f32.mrb[22].mxu0  ;;  %1931 = vmatprep.mubr.msk.bf16.mxu1 %vm474_vm1, %v427_v34 }
 0x10a   :  { %v409_v40 = vmax.f32 %v349_v36, 0.0  ;;  %v352_v41 = vadd.f32 %v1898_v39, %v2251_v27  ;;  %v343_v42 = vpop.f32.mrb[23].mxu0  ;;  %1932 = vmatmul.mubr.msk.bf16.gmra.mrb[16].mxu1 %vm474_vm1, %v428_v33 }
 0x10b   :  { %v407_v43 = vmax.f32 %v341_v38, 0.0  ;;  %v344_v44 = vadd.f32 %v2251_v27, %v343_v42 }
 0x10c   :  { %v410_v45 = vmax.f32 %v352_v41, 0.0 }
 0x10d   :  { %v408_v46 = vmax.f32 %v344_v44, 0.0 }
 0x10e   :  { %v430_v47 = vpack.c.bf16 %v410_v45, %v409_v40 }
 0x10f   :  { %v429_v48 = vpack.c.bf16 %v408_v46, %v407_v43  ;;  %v1901_v49 = vpop.f32.mrb[24].mxu0 }
 0x110   :  { %v365_v50 = vadd.f32 %v1901_v49, %v2251_v27  ;;  %v356_v51 = vpop.f32.mrb[25].mxu0 }
 0x111   :  { %v357_v52 = vadd.f32 %v2251_v27, %v356_v51  ;;  %v1902_v53 = vpop.f32.mrb[26].mxu0  ;;  %1935 = vmatprep.mubr.msk.bf16.mxu1 %vm474_vm1, %v429_v48 }
 0x112   :  { %v413_v54 = vmax.f32 %v365_v50, 0.0  ;;  %v368_v55 = vadd.f32 %v1902_v53, %v2251_v27  ;;  %v359_v56 = vpop.f32.mrb[27].mxu0  ;;  %1936 = vmatmul.mubr.msk.bf16.gmra.mrb[20].mxu1 %vm474_vm1, %v430_v47 }
 0x113   :  { %v411_v57 = vmax.f32 %v357_v52, 0.0  ;;  %v360_v58 = vadd.f32 %v2251_v27, %v359_v56 }
 0x114   :  { %v414_v59 = vmax.f32 %v368_v55, 0.0 }
 0x115   :  { %v412_v60 = vmax.f32 %v360_v58, 0.0 }
 0x116   :  { %v432_v61 = vpack.c.bf16 %v414_v59, %v413_v54 }
 0x117   :  { %v431_v62 = vpack.c.bf16 %v412_v60, %v411_v57  ;;  %v1905_v63 = vpop.f32.mrb[28].mxu0 }
 0x118   :  { %v381_v0 = vadd.f32 %v1905_v63, %v2251_v27  ;;  %v372_v1 = vpop.f32.mrb[29].mxu0 }
 0x119   :  { %v373_v2 = vadd.f32 %v2251_v27, %v372_v1  ;;  %v1906_v3 = vpop.f32.mrb[30].mxu0  ;;  %1939 = vmatprep.mubr.msk.bf16.mxu1 %vm474_vm1, %v431_v62 }
 0x11a   :  { %v417_v4 = vmax.f32 %v381_v0, 0.0  ;;  %v384_v5 = vadd.f32 %v1906_v3, %v2251_v27  ;;  %v375_v6 = vpop.f32.mrb[31].mxu0  ;;  %1940 = vmatmul.mubr.msk.bf16.gmra.mrb[24].mxu1 %vm474_vm1, %v432_v61 }
 0x11b   :  { %v415_v7 = vmax.f32 %v373_v2, 0.0  ;;  %v376_v8 = vadd.f32 %v2251_v27, %v375_v6  ;;  %v2061_v27 = vld [vmem:[%s2837_s7 + $0x10] sm:$0xff]  }
 0x11c   :  { %v418_v9 = vmax.f32 %v384_v5, 0.0  ;;  %1991 = vmatprep.subr.bf16.mxu1 %v2061_v27 }
 0x11d   :  { %v416_v10 = vmax.f32 %v376_v8, 0.0  ;;  %1992 = vmatpush3.bf16.msra.mxu1 %v2061_v27 }
 0x11e   :  { %v434_v11 = vpack.c.bf16 %v418_v9, %v417_v4  ;;  %1993 = vmatprep.subr.bf16.mxu1 %v2062_v15 }
 0x11f   :  { %v433_v12 = vpack.c.bf16 %v416_v10, %v415_v7 }
 0x121   :  { %1943 = vmatprep.mubr.msk.bf16.mxu1 %vm474_vm1, %v433_v12  ;;  %1994 = vmatpush3.bf16.msra.mxu1 %v2062_v15 }
 0x122   :  { %1944 = vmatmul.mubr.msk.bf16.gmra.mrb[28].mxu1 %vm474_vm1, %v434_v11 }
 0x1bd   :  { %v1917_v17 = vpop.f32.mrb[0].mxu1 }
 0x1be   :  { %v566_v18 = vadd.f32 %v1917_v17, %v2316_v16  ;;  %v557_v19 = vpop.f32.mrb[1].mxu1 }
 0x1bf   :  { %v558_v20 = vadd.f32 %v2316_v16, %v557_v19  ;;  %v1918_v21 = vpop.f32.mrb[2].mxu1 }
 0x1c0   :  { %v569_v22 = vadd.f32 %v1918_v21, %v2316_v16  ;;  %v560_v23 = vpop.f32.mrb[3].mxu1  ;;  %v686_v25 = vmax.f32 %v566_v18, 0.0 }
 0x1c1   :  { %v561_v24 = vadd.f32 %v2316_v16, %v560_v23  ;;  %v684_v28 = vmax.f32 %v558_v20, 0.0 }
 0x1c2   :  { %v687_v26 = vmax.f32 %v569_v22, 0.0 }
 0x1c3   :  { %v685_v29 = vmax.f32 %v561_v24, 0.0 }
 0x1c4   :  { %v717_v30 = vpack.c.bf16 %v687_v26, %v686_v25 }
 0x1c5   :  { %v716_v31 = vpack.c.bf16 %v685_v29, %v684_v28  ;;  %v1921_v32 = vpop.f32.mrb[4].mxu1 }
 0x1c6   :  { %v582_v33 = vadd.f32 %v1921_v32, %v2316_v16  ;;  %v573_v34 = vpop.f32.mrb[5].mxu1 }
 0x1c7   :  { %v574_v35 = vadd.f32 %v2316_v16, %v573_v34  ;;  %v1922_v36 = vpop.f32.mrb[6].mxu1  ;;  %1955 = vmatprep.mubr.msk.bf16.mxu0 %vm474_vm1, %v716_v31 }
 0x1c8   :  { %v585_v37 = vadd.f32 %v1922_v36, %v2316_v16  ;;  %v576_v38 = vpop.f32.mrb[7].mxu1  ;;  %1956 = vmatmul.mubr.msk.bf16.vlgmr.msra.gmra.mrb[32].mxu0 %vm474_vm1, %v717_v30  ;;  %v690_v40 = vmax.f32 %v582_v33, 0.0 }
 0x1c9   :  { %v577_v39 = vadd.f32 %v2316_v16, %v576_v38  ;;  %v688_v42 = vmax.f32 %v574_v35, 0.0 }
 0x1ca   :  { %v691_v41 = vmax.f32 %v585_v37, 0.0 }
 0x1cb   :  { %v689_v43 = vmax.f32 %v577_v39, 0.0 }
 0x1cc   :  { %v719_v44 = vpack.c.bf16 %v691_v41, %v690_v40 }
 0x1cd   :  { %v718_v45 = vpack.c.bf16 %v689_v43, %v688_v42  ;;  %v1925_v46 = vpop.f32.mrb[8].mxu1 }
 0x1ce   :  { %v598_v47 = vadd.f32 %v1925_v46, %v2316_v16  ;;  %v589_v48 = vpop.f32.mrb[9].mxu1 }
 0x1cf   :  { %v590_v49 = vadd.f32 %v2316_v16, %v589_v48  ;;  %v1926_v50 = vpop.f32.mrb[10].mxu1  ;;  %1959 = vmatprep.mubr.msk.bf16.mxu0 %vm474_vm1, %v718_v45 }
 0x1d0   :  { %v694_v51 = vmax.f32 %v598_v47, 0.0  ;;  %v601_v52 = vadd.f32 %v1926_v50, %v2316_v16  ;;  %v592_v53 = vpop.f32.mrb[11].mxu1  ;;  %1960 = vmatmul.mubr.msk.bf16.gmra.mrb[36].mxu0 %vm474_vm1, %v719_v44 }
 0x1d1   :  { %v692_v54 = vmax.f32 %v590_v49, 0.0  ;;  %v593_v55 = vadd.f32 %v2316_v16, %v592_v53 }
 0x1d2   :  { %v695_v56 = vmax.f32 %v601_v52, 0.0 }
 0x1d3   :  { %v693_v57 = vmax.f32 %v593_v55, 0.0 }
 0x1d4   :  { %v721_v58 = vpack.c.bf16 %v695_v56, %v694_v51 }
 0x1d5   :  { %v720_v59 = vpack.c.bf16 %v693_v57, %v692_v54  ;;  %v1929_v60 = vpop.f32.mrb[12].mxu1 }
 0x1d6   :  { %v614_v61 = vadd.f32 %v1929_v60, %v2316_v16  ;;  %v605_v62 = vpop.f32.mrb[13].mxu1 }
 0x1d7   :  { %v606_v63 = vadd.f32 %v2316_v16, %v605_v62  ;;  %v1930_v0 = vpop.f32.mrb[14].mxu1  ;;  %1963 = vmatprep.mubr.msk.bf16.mxu0 %vm474_vm1, %v720_v59 }
 0x1d8   :  { %v698_v1 = vmax.f32 %v614_v61, 0.0  ;;  %v617_v2 = vadd.f32 %v1930_v0, %v2316_v16  ;;  %v608_v3 = vpop.f32.mrb[15].mxu1  ;;  %1964 = vmatmul.mubr.msk.bf16.gmra.mrb[40].mxu0 %vm474_vm1, %v721_v58 }
 0x1d9   :  { %v696_v4 = vmax.f32 %v606_v63, 0.0  ;;  %v609_v5 = vadd.f32 %v2316_v16, %v608_v3  ;;  %v2369_v3 = vld [vmem:[%s2836_s6] ss:$0 sm:$0xff] }
 0x1da   :  { %v699_v6 = vmax.f32 %v617_v2, 0.0 }
 0x1db   :  { %v697_v7 = vmax.f32 %v609_v5, 0.0 }
 0x1dc   :  { %v723_v8 = vpack.c.bf16 %v699_v6, %v698_v1 }
 0x1dd   :  { %v722_v9 = vpack.c.bf16 %v697_v7, %v696_v4  ;;  %v1933_v10 = vpop.f32.mrb[16].mxu1 }
 0x1de   :  { %v630_v11 = vadd.f32 %v1933_v10, %v2316_v16  ;;  %v621_v12 = vpop.f32.mrb[17].mxu1 }
 0x1df   :  { %v622_v13 = vadd.f32 %v2316_v16, %v621_v12  ;;  %v1934_v14 = vpop.f32.mrb[18].mxu1  ;;  %1967 = vmatprep.mubr.msk.bf16.mxu0 %vm474_vm1, %v722_v9 }
 0x1e0   :  { %v702_v27 = vmax.f32 %v630_v11, 0.0  ;;  %v633_v15 = vadd.f32 %v1934_v14, %v2316_v16  ;;  %v624_v17 = vpop.f32.mrb[19].mxu1  ;;  %1968 = vmatmul.mubr.msk.bf16.gmra.mrb[44].mxu0 %vm474_vm1, %v723_v8 }
 0x1e1   :  { %v700_v18 = vmax.f32 %v622_v13, 0.0  ;;  %v625_v19 = vadd.f32 %v2316_v16, %v624_v17 }
 0x1e2   :  { %v703_v20 = vmax.f32 %v633_v15, 0.0 }
 0x1e3   :  { %v701_v21 = vmax.f32 %v625_v19, 0.0 }
 0x1e4   :  { %v725_v22 = vpack.c.bf16 %v703_v20, %v702_v27 }
 0x1e5   :  { %v724_v23 = vpack.c.bf16 %v701_v21, %v700_v18  ;;  %v1937_v24 = vpop.f32.mrb[20].mxu1 }
 0x1e6   :  { %v646_v25 = vadd.f32 %v1937_v24, %v2316_v16  ;;  %v637_v26 = vpop.f32.mrb[21].mxu1 }
 0x1e7   :  { %v638_v28 = vadd.f32 %v2316_v16, %v637_v26  ;;  %v1938_v29 = vpop.f32.mrb[22].mxu1  ;;  %1971 = vmatprep.mubr.msk.bf16.mxu0 %vm474_vm1, %v724_v23 }
 0x1e8   :  { %v706_v30 = vmax.f32 %v646_v25, 0.0  ;;  %v649_v31 = vadd.f32 %v1938_v29, %v2316_v16  ;;  %v640_v32 = vpop.f32.mrb[23].mxu1  ;;  %1972 = vmatmul.mubr.msk.bf16.gmra.mrb[48].mxu0 %vm474_vm1, %v725_v22 }
 0x1e9   :  { %v704_v33 = vmax.f32 %v638_v28, 0.0  ;;  %v641_v34 = vadd.f32 %v2316_v16, %v640_v32 }
 0x1ea   :  { %v707_v35 = vmax.f32 %v649_v31, 0.0 }
 0x1eb   :  { %v705_v36 = vmax.f32 %v641_v34, 0.0 }
 0x1ec   :  { %v727_v37 = vpack.c.bf16 %v707_v35, %v706_v30 }
 0x1ed   :  { %v726_v38 = vpack.c.bf16 %v705_v36, %v704_v33  ;;  %v1941_v39 = vpop.f32.mrb[24].mxu1 }
 0x1ee   :  { %v662_v40 = vadd.f32 %v1941_v39, %v2316_v16  ;;  %v653_v41 = vpop.f32.mrb[25].mxu1 }
 0x1ef   :  { %v654_v42 = vadd.f32 %v2316_v16, %v653_v41  ;;  %v1942_v43 = vpop.f32.mrb[26].mxu1  ;;  %1975 = vmatprep.mubr.msk.bf16.mxu0 %vm474_vm1, %v726_v38 }
 0x1f0   :  { %v710_v44 = vmax.f32 %v662_v40, 0.0  ;;  %v665_v45 = vadd.f32 %v1942_v43, %v2316_v16  ;;  %v656_v46 = vpop.f32.mrb[27].mxu1  ;;  %1976 = vmatmul.mubr.msk.bf16.gmra.mrb[52].mxu0 %vm474_vm1, %v727_v37 }
 0x1f1   :  { %v708_v47 = vmax.f32 %v654_v42, 0.0  ;;  %v657_v48 = vadd.f32 %v2316_v16, %v656_v46 }
 0x1f2   :  { %v711_v49 = vmax.f32 %v665_v45, 0.0 }
 0x1f3   :  { %v709_v50 = vmax.f32 %v657_v48, 0.0 }
 0x1f4   :  { %v729_v51 = vpack.c.bf16 %v711_v49, %v710_v44 }
 0x1f5   :  { %v728_v52 = vpack.c.bf16 %v709_v50, %v708_v47  ;;  %v1945_v53 = vpop.f32.mrb[28].mxu1 }
 0x1f6   :  { %v678_v54 = vadd.f32 %v1945_v53, %v2316_v16  ;;  %v669_v55 = vpop.f32.mrb[29].mxu1 }
 0x1f7   :  { %v670_v56 = vadd.f32 %v2316_v16, %v669_v55  ;;  %v1946_v57 = vpop.f32.mrb[30].mxu1  ;;  %1979 = vmatprep.mubr.msk.bf16.mxu0 %vm474_vm1, %v728_v52 }
 0x1f8   :  { %v714_v58 = vmax.f32 %v678_v54, 0.0  ;;  %v681_v59 = vadd.f32 %v1946_v57, %v2316_v16  ;;  %v672_v60 = vpop.f32.mrb[31].mxu1  ;;  %1980 = vmatmul.mubr.msk.bf16.gmra.mrb[56].mxu0 %vm474_vm1, %v729_v51 }
 0x1f9   :  { %v712_v61 = vmax.f32 %v670_v56, 0.0  ;;  %v673_v62 = vadd.f32 %v2316_v16, %v672_v60 }
 0x1fa   :  { %v715_v63 = vmax.f32 %v681_v59, 0.0 }
 0x1fb   :  { %v713_v0 = vmax.f32 %v673_v62, 0.0 }
 0x1fc   :  { %v731_v1 = vpack.c.bf16 %v715_v63, %v714_v58 }
 0x1fd   :  { %v730_v2 = vpack.c.bf16 %v713_v0, %v712_v61 }
 0x1ff   :  { %1983 = vmatprep.mubr.msk.bf16.mxu0 %vm474_vm1, %v730_v2 }
 0x200   :  { %1984 = vmatmul.mubr.msk.bf16.gmra.mrb[60].mxu0 %vm474_vm1, %v731_v1 }
 0x29b   :  { %v1957_v4 = vpop.f32.mrb[32].mxu0 }
 0x29c   :  { %v862_v5 = vadd.f32 %v1957_v4, %v2369_v3  ;;  %v853_v6 = vpop.f32.mrb[33].mxu0 }
 0x29d   :  { %v854_v7 = vadd.f32 %v2369_v3, %v853_v6  ;;  %v1958_v16 = vpop.f32.mrb[34].mxu0 }
 0x29e   :  { %v865_v8 = vadd.f32 %v1958_v16, %v2369_v3  ;;  %v856_v9 = vpop.f32.mrb[35].mxu0  ;;  %v982_v11 = vmax.f32 %v862_v5, 0.0 }
 0x29f   :  { %v857_v10 = vadd.f32 %v2369_v3, %v856_v9  ;;  %v980_v13 = vmax.f32 %v854_v7, 0.0 }
 0x2a0   :  { %v983_v12 = vmax.f32 %v865_v8, 0.0 }
 0x2a1   :  { %v981_v14 = vmax.f32 %v857_v10, 0.0 }
 0x2a2   :  { %v1013_v27 = vpack.c.bf16 %v983_v12, %v982_v11 }
 0x2a3   :  { %v1012_v15 = vpack.c.bf16 %v981_v14, %v980_v13  ;;  %v1961_v17 = vpop.f32.mrb[36].mxu0 }
 0x2a4   :  { %v878_v18 = vadd.f32 %v1961_v17, %v2369_v3  ;;  %v869_v19 = vpop.f32.mrb[37].mxu0 }
 0x2a5   :  { %v870_v20 = vadd.f32 %v2369_v3, %v869_v19  ;;  %v1962_v21 = vpop.f32.mrb[38].mxu0  ;;  %1995 = vmatprep.mubr.msk.bf16.mxu1 %vm474_vm1, %v1012_v15 }
 0x2a6   :  { %v881_v22 = vadd.f32 %v1962_v21, %v2369_v3  ;;  %v872_v23 = vpop.f32.mrb[39].mxu0  ;;  %1996 = vmatmul.mubr.msk.bf16.vlgmr.msra.gmra.mrb[32].mxu1 %vm474_vm1, %v1013_v27  ;;  %v986_v25 = vmax.f32 %v878_v18, 0.0 }
 0x2a7   :  { %v873_v24 = vadd.f32 %v2369_v3, %v872_v23  ;;  %v984_v28 = vmax.f32 %v870_v20, 0.0 }
 0x2a8   :  { %v987_v26 = vmax.f32 %v881_v22, 0.0 }
 0x2a9   :  { %v985_v29 = vmax.f32 %v873_v24, 0.0 }
 0x2aa   :  { %v1015_v30 = vpack.c.bf16 %v987_v26, %v986_v25 }
 0x2ab   :  { %v1014_v31 = vpack.c.bf16 %v985_v29, %v984_v28  ;;  %v1965_v32 = vpop.f32.mrb[40].mxu0 }
 0x2ac   :  { %v894_v33 = vadd.f32 %v1965_v32, %v2369_v3  ;;  %v885_v34 = vpop.f32.mrb[41].mxu0 }
 0x2ad   :  { %v886_v35 = vadd.f32 %v2369_v3, %v885_v34  ;;  %v1966_v36 = vpop.f32.mrb[42].mxu0  ;;  %1999 = vmatprep.mubr.msk.bf16.mxu1 %vm474_vm1, %v1014_v31 }
 0x2ae   :  { %v897_v37 = vadd.f32 %v1966_v36, %v2369_v3  ;;  %v888_v38 = vpop.f32.mrb[43].mxu0  ;;  %2000 = vmatmul.mubr.msk.bf16.gmra.mrb[36].mxu1 %vm474_vm1, %v1015_v30  ;;  %v990_v40 = vmax.f32 %v894_v33, 0.0 }
 0x2af   :  { %v889_v39 = vadd.f32 %v2369_v3, %v888_v38  ;;  %v988_v42 = vmax.f32 %v886_v35, 0.0 }
 0x2b0   :  { %v991_v41 = vmax.f32 %v897_v37, 0.0 }
 0x2b1   :  { %v989_v43 = vmax.f32 %v889_v39, 0.0 }
 0x2b2   :  { %v1017_v44 = vpack.c.bf16 %v991_v41, %v990_v40 }
 0x2b3   :  { %v1016_v45 = vpack.c.bf16 %v989_v43, %v988_v42  ;;  %v1969_v46 = vpop.f32.mrb[44].mxu0 }
 0x2b4   :  { %v910_v47 = vadd.f32 %v1969_v46, %v2369_v3  ;;  %v901_v48 = vpop.f32.mrb[45].mxu0 }
 0x2b5   :  { %v902_v49 = vadd.f32 %v2369_v3, %v901_v48  ;;  %v1970_v50 = vpop.f32.mrb[46].mxu0  ;;  %2003 = vmatprep.mubr.msk.bf16.mxu1 %vm474_vm1, %v1016_v45 }
 0x2b6   :  { %v913_v51 = vadd.f32 %v1970_v50, %v2369_v3  ;;  %v904_v52 = vpop.f32.mrb[47].mxu0  ;;  %2004 = vmatmul.mubr.msk.bf16.gmra.mrb[40].mxu1 %vm474_vm1, %v1017_v44  ;;  %v994_v54 = vmax.f32 %v910_v47, 0.0 }
 0x2b7   :  { %v905_v53 = vadd.f32 %v2369_v3, %v904_v52  ;;  %v992_v56 = vmax.f32 %v902_v49, 0.0 }
 0x2b8   :  { %v995_v55 = vmax.f32 %v913_v51, 0.0 }
 0x2b9   :  { %v993_v57 = vmax.f32 %v905_v53, 0.0  ;;  %v2422_v53 = vld [vmem:[%s2838_s8] ss:$0 sm:$0xff]  ;;  %s2088_s8 = smov [#allocation3]  }
 0x2ba   :  { %v1019_v58 = vpack.c.bf16 %v995_v55, %v994_v54 }
 0x2bb   :  { %v1018_v59 = vpack.c.bf16 %v993_v57, %v992_v56  ;;  %v1973_v60 = vpop.f32.mrb[48].mxu0 }
 0x2bc   :  { %v926_v61 = vadd.f32 %v1973_v60, %v2369_v3  ;;  %v917_v62 = vpop.f32.mrb[49].mxu0 }
 0x2bd   :  { %v918_v63 = vadd.f32 %v2369_v3, %v917_v62  ;;  %v1974_v0 = vpop.f32.mrb[50].mxu0  ;;  %2007 = vmatprep.mubr.msk.bf16.mxu1 %vm474_vm1, %v1018_v59 }
 0x2be   :  { %v929_v1 = vadd.f32 %v1974_v0, %v2369_v3  ;;  %v920_v2 = vpop.f32.mrb[51].mxu0  ;;  %2008 = vmatmul.mubr.msk.bf16.gmra.mrb[44].mxu1 %vm474_vm1, %v1019_v58  ;;  %v998_v5 = vmax.f32 %v926_v61, 0.0  ;;  %v2433_v58 = vld [vmem:[%s2839_s9] ss:$0 sm:$0xff]  ;;  %s1682_s9 = sshll.u32 %s2088_s8, 4  ;;  %s1683_s9 = int_to_ptr.vmem [resolvable:$true] %s1682_s9 }
 0x2bf   :  { %v921_v4 = vadd.f32 %v2369_v3, %v920_v2  ;;  %v996_v7 = vmax.f32 %v918_v63, 0.0  ;;  %s2063_s19 = scalar_lea.vmem %s1683_s9, 4096  ;;  %p2068_p1 = scmp.lt.s32.totalorder %s1683_s9, %s1683_s9 }
 0x2c0   :  { %v999_v6 = vmax.f32 %v929_v1, 0.0  ;;  %p2064_p0 = scmp.ne.s32.totalorder %s1683_s9, %s2063_s19  ;;  %p2069_p2 = scmp.lt.s32.totalorder %s2063_s19, %s2063_s19 }
 0x2c1   :  { %v997_v16 = vmax.f32 %v921_v4, 0.0 }
 0x2c2   :  { %v1021_v8 = vpack.c.bf16 %v999_v6, %v998_v5  ;;  %p2070_p3 = por %p2069_p2, %p2068_p1 }
 0x2c3   :  { %v1020_v9 = vpack.c.bf16 %v997_v16, %v996_v7  ;;  %v1977_v10 = vpop.f32.mrb[52].mxu0 }
 0x2c4   :  { %v942_v11 = vadd.f32 %v1977_v10, %v2369_v3  ;;  %v933_v12 = vpop.f32.mrb[53].mxu0  ;;  %p2071_p4 = pnand %p2070_p3, %p2064_p0 }
 0x2c5   :  { %v934_v13 = vadd.f32 %v2369_v3, %v933_v12  ;;  %v1978_v14 = vpop.f32.mrb[54].mxu0  ;;  %2011 = vmatprep.mubr.msk.bf16.mxu1 %vm474_vm1, %v1020_v9 }
 0x2c6   :  { %v945_v27 = vadd.f32 %v1978_v14, %v2369_v3  ;;  %v936_v15 = vpop.f32.mrb[55].mxu0  ;;  %2012 = vmatmul.mubr.msk.bf16.gmra.mrb[48].mxu1 %vm474_vm1, %v1021_v8  ;;  %v1002_v18 = vmax.f32 %v942_v11, 0.0 }
 0x2c7   :  { %v937_v17 = vadd.f32 %v2369_v3, %v936_v15  ;;  %v1000_v20 = vmax.f32 %v934_v13, 0.0 }
 0x2c8   :  { %v1003_v19 = vmax.f32 %v945_v27, 0.0 }
 0x2c9   :  { %v1001_v21 = vmax.f32 %v937_v17, 0.0 }
 0x2ca   :  { %v1023_v22 = vpack.c.bf16 %v1003_v19, %v1002_v18 }
 0x2cb   :  { %v1022_v23 = vpack.c.bf16 %v1001_v21, %v1000_v20  ;;  %v1981_v24 = vpop.f32.mrb[56].mxu0 }
 0x2cc   :  { %v958_v25 = vadd.f32 %v1981_v24, %v2369_v3  ;;  %v949_v26 = vpop.f32.mrb[57].mxu0 }
 0x2cd   :  { %v950_v28 = vadd.f32 %v2369_v3, %v949_v26  ;;  %v1982_v29 = vpop.f32.mrb[58].mxu0  ;;  %2015 = vmatprep.mubr.msk.bf16.mxu1 %vm474_vm1, %v1022_v23 }
 0x2ce   :  { %v961_v30 = vadd.f32 %v1982_v29, %v2369_v3  ;;  %v952_v31 = vpop.f32.mrb[59].mxu0  ;;  %2016 = vmatmul.mubr.msk.bf16.gmra.mrb[52].mxu1 %vm474_vm1, %v1023_v22  ;;  %v1006_v33 = vmax.f32 %v958_v25, 0.0 }
 0x2cf   :  { %v953_v32 = vadd.f32 %v2369_v3, %v952_v31  ;;  %v1004_v35 = vmax.f32 %v950_v28, 0.0 }
 0x2d0   :  { %v1007_v34 = vmax.f32 %v961_v30, 0.0 }
 0x2d1   :  { %v1005_v36 = vmax.f32 %v953_v32, 0.0 }
 0x2d2   :  { %v1025_v37 = vpack.c.bf16 %v1007_v34, %v1006_v33 }
 0x2d3   :  { %v1024_v38 = vpack.c.bf16 %v1005_v36, %v1004_v35  ;;  %v1985_v39 = vpop.f32.mrb[60].mxu0  ;;  %v2087_v35 = vmov 0  }
 0x2d4   :  { %v974_v40 = vadd.f32 %v1985_v39, %v2369_v3  ;;  %v965_v41 = vpop.f32.mrb[61].mxu0  ;;  %2031 = vset.pattern.permute.xlu1 %v2087_v35  ;;  %2032 = vset.pattern.permute.xlu0 %v2087_v35 }
 0x2d5   :  { %v966_v42 = vadd.f32 %v2369_v3, %v965_v41  ;;  %v1986_v43 = vpop.f32.mrb[62].mxu0  ;;  %2019 = vmatprep.mubr.msk.bf16.mxu1 %vm474_vm1, %v1024_v38 }
 0x2d6   :  { %v977_v44 = vadd.f32 %v1986_v43, %v2369_v3  ;;  %v968_v45 = vpop.f32.mrb[63].mxu0  ;;  %2020 = vmatmul.mubr.msk.bf16.gmra.mrb[56].mxu1 %vm474_vm1, %v1025_v37  ;;  %v1010_v47 = vmax.f32 %v974_v40, 0.0 }
 0x2d7   :  { %v969_v46 = vadd.f32 %v2369_v3, %v968_v45  ;;  %v1008_v49 = vmax.f32 %v966_v42, 0.0 }
 0x2d8   :  { %v1011_v48 = vmax.f32 %v977_v44, 0.0 }
 0x2d9   :  { %v1009_v50 = vmax.f32 %v969_v46, 0.0 }
 0x2da   :  { %v1027_v51 = vpack.c.bf16 %v1011_v48, %v1010_v47 }
 0x2db   :  { %v1026_v52 = vpack.c.bf16 %v1009_v50, %v1008_v49 }
 0x2dd   :  { %2023 = vmatprep.mubr.msk.bf16.mxu1 %vm474_vm1, %v1026_v52 }
 0x2de   :  { %2024 = vmatmul.mubr.msk.bf16.gmra.mrb[60].mxu1 %vm474_vm1, %v1027_v51 }
 0x379   :  { %v1997_v54 = vpop.f32.mrb[32].mxu1 }
 0x37a   :  { %v2425_v55 = vadd.f32 %v1997_v54, %v2422_v53  ;;  %v1149_v3 = vpop.f32.mrb[33].mxu1 }
 0x37b   :  { %v2428_v56 = vadd.f32 %v2422_v53, %v1149_v3  ;;  %v1998_v57 = vpop.f32.mrb[34].mxu1 }
 0x37c   :  { %v1278_v59 = vmax.f32 %v2425_v55, 0.0  ;;  %v2437_v60 = vadd.f32 %v1998_v57, %v2422_v53  ;;  %v1152_v61 = vpop.f32.mrb[35].mxu1 }
 0x37d   :  { %v1276_v62 = vmax.f32 %v2428_v56, 0.0  ;;  %v2441_v63 = vadd.f32 %v2422_v53, %v1152_v61 }
 0x37e   :  { %v1279_v0 = vmax.f32 %v2437_v60, 0.0  ;;  %v1317_v1 = vmul.f32 %v2433_v58, %v1278_v59 }
 0x37f   :  { %v1277_v2 = vmax.f32 %v2441_v63, 0.0  ;;  %v1315_v4 = vmul.f32 %v2433_v58, %v1276_v62 }
 0x380   :  { %1351 = vadd.xlane.f32.xlu1 %v1317_v1  ;;  %v1318_v16 = vmul.f32 %v2433_v58, %v1279_v0 }
 0x381   :  { %v2001_v5 = vpop.f32.mrb[36].mxu1  ;;  %1347 = vadd.xlane.f32.xlu0 %v1315_v4  ;;  %v1316_v10 = vmul.f32 %v2433_v58, %v1277_v2 }
 0x382   :  { %v2452_v6 = vadd.f32 %v2001_v5, %v2422_v53  ;;  %v1165_v7 = vpop.f32.mrb[37].mxu1 }
 0x383   :  { %v2458_v8 = vadd.f32 %v2422_v53, %v1165_v7  ;;  %v2002_v9 = vpop.f32.mrb[38].mxu1 }
 0x384   :  { %v1282_v11 = vmax.f32 %v2452_v6, 0.0  ;;  %v2465_v12 = vadd.f32 %v2002_v9, %v2422_v53  ;;  %1353 = vadd.xlane.f32.xlu1 %v1318_v16  ;;  %v1168_v13 = vpop.f32.mrb[39].mxu1 }
 0x385   :  { %v2468_v14 = vadd.f32 %v2422_v53, %v1168_v13  ;;  %1349 = vadd.xlane.f32.xlu0 %v1316_v10  ;;  %v1280_v17 = vmax.f32 %v2458_v8, 0.0 }
 0x386   :  { %v1283_v27 = vmax.f32 %v2465_v12, 0.0  ;;  %v1321_v15 = vmul.f32 %v2433_v58, %v1282_v11 }
 0x387   :  { %v1281_v18 = vmax.f32 %v2468_v14, 0.0  ;;  %v1319_v25 = vmul.f32 %v2433_v58, %v1280_v17 }
 0x388   :  { %v1322_v19 = vmul.f32 %v2433_v58, %v1283_v27 }
 0x389   :  { %v2005_v20 = vpop.f32.mrb[40].mxu1  ;;  %1359 = vadd.xlane.f32.xlu0 %v1321_v15  ;;  %v1320_v30 = vmul.f32 %v2433_v58, %v1281_v18 }
 0x38a   :  { %v2480_v21 = vadd.f32 %v2005_v20, %v2422_v53  ;;  %1361 = vadd.xlane.f32.xlu1 %v1322_v19  ;;  %v1181_v22 = vpop.f32.mrb[41].mxu1 }
 0x38b   :  { %v2483_v23 = vadd.f32 %v2422_v53, %v1181_v22  ;;  %v2006_v24 = vpop.f32.mrb[42].mxu1 }
 0x38c   :  { %v1286_v26 = vmax.f32 %v2480_v21, 0.0  ;;  %v2490_v28 = vadd.f32 %v2006_v24, %v2422_v53  ;;  %v1184_v29 = vpop.f32.mrb[43].mxu1 }
 0x38d   :  { %v2496_v31 = vadd.f32 %v2422_v53, %v1184_v29  ;;  %1355 = vadd.xlane.f32.xlu0 %v1319_v25  ;;  %v1284_v34 = vmax.f32 %v2483_v23, 0.0 }
 0x38e   :  { %v1287_v32 = vmax.f32 %v2490_v28, 0.0  ;;  %1357 = vadd.xlane.f32.xlu1 %v1320_v30  ;;  %v1325_v33 = vmul.f32 %v2433_v58, %v1286_v26 }
 0x38f   :  { %v1285_v36 = vmax.f32 %v2496_v31, 0.0  ;;  %v1323_v43 = vmul.f32 %v2433_v58, %v1284_v34 }
 0x390   :  { %v1326_v37 = vmul.f32 %v2433_v58, %v1287_v32 }
 0x391   :  { %v2009_v38 = vpop.f32.mrb[44].mxu1  ;;  %1367 = vadd.xlane.f32.xlu0 %v1325_v33  ;;  %v1324_v47 = vmul.f32 %v2433_v58, %v1285_v36 }
 0x392   :  { %v2508_v39 = vadd.f32 %v2009_v38, %v2422_v53  ;;  %v1197_v40 = vpop.f32.mrb[45].mxu1  ;;  %1369 = vadd.xlane.f32.xlu1 %v1326_v37 }
 0x393   :  { %v2511_v41 = vadd.f32 %v2422_v53, %v1197_v40  ;;  %v2010_v42 = vpop.f32.mrb[46].mxu1 }
 0x394   :  { %v1290_v44 = vmax.f32 %v2508_v39, 0.0  ;;  %v2518_v45 = vadd.f32 %v2010_v42, %v2422_v53  ;;  %v1200_v46 = vpop.f32.mrb[47].mxu1 }
 0x395   :  { %v2524_v48 = vadd.f32 %v2422_v53, %v1200_v46  ;;  %1363 = vadd.xlane.f32.xlu0 %v1323_v43  ;;  %v2856_v51 = vmax.f32 %v2511_v41, 0.0 }
 0x396   :  { %v1291_v49 = vmax.f32 %v2518_v45, 0.0  ;;  %1365 = vadd.xlane.f32.xlu1 %v1324_v47  ;;  %v1329_v50 = vmul.f32 %v2433_v58, %v1290_v44 }
 0x397   :  { %v1289_v52 = vmax.f32 %v2524_v48, 0.0  ;;  %v1327_v5 = vmul.f32 %v2433_v58, %v2856_v51 }
 0x398   :  { %v1330_v54 = vmul.f32 %v2433_v58, %v1291_v49 }
 0x399   :  { %v2013_v3 = vpop.f32.mrb[48].mxu1  ;;  %1375 = vadd.xlane.f32.xlu0 %v1329_v50  ;;  %v1328_v10 = vmul.f32 %v2433_v58, %v1289_v52 }
 0x39a   :  { %v2536_v57 = vadd.f32 %v2013_v3, %v2422_v53  ;;  %v1213_v61 = vpop.f32.mrb[49].mxu1  ;;  %1377 = vadd.xlane.f32.xlu1 %v1330_v54 }
 0x39b   :  { %v2539_v1 = vadd.f32 %v2422_v53, %v1213_v61  ;;  %v2014_v4 = vpop.f32.mrb[50].mxu1 }
 0x39c   :  { %v2853_v7 = vmax.f32 %v2536_v57, 0.0  ;;  %v2546_v16 = vadd.f32 %v2014_v4, %v2422_v53  ;;  %v1216_v9 = vpop.f32.mrb[51].mxu1 }
 0x39d   :  { %v2552_v13 = vadd.f32 %v2422_v53, %v1216_v9  ;;  %1371 = vadd.xlane.f32.xlu0 %v1327_v5  ;;  %v2845_v20 = vmax.f32 %v2539_v1, 0.0 }
 0x39e   :  { %v1295_v15 = vmax.f32 %v2546_v16, 0.0  ;;  %1373 = vadd.xlane.f32.xlu1 %v1328_v10  ;;  %v1333_v19 = vmul.f32 %v2433_v58, %v2853_v7  ;;  %v2859_v16 = vmax.f32 %v2511_v41, 0.0 }
 0x39f   :  { %v2857_v22 = vmax.f32 %v2552_v13, 0.0  ;;  %v1331_v37 = vmul.f32 %v2433_v58, %v2845_v20  ;;  %v2858_v23 = vmax.f32 %v2552_v13, 0.0  ;;  %v2861_v13 = vmax.f32 %v2536_v57, 0.0 }
 0x3a0   :  { %v1334_v24 = vmul.f32 %v2433_v58, %v1295_v15 }
 0x3a1   :  { %v2017_v25 = vpop.f32.mrb[52].mxu1  ;;  %1383 = vadd.xlane.f32.xlu0 %v1333_v19  ;;  %v1332_v43 = vmul.f32 %v2433_v58, %v2857_v22 }
 0x3a2   :  { %v2564_v29 = vadd.f32 %v2017_v25, %v2422_v53  ;;  %v1229_v30 = vpop.f32.mrb[53].mxu1  ;;  %1385 = vadd.xlane.f32.xlu1 %v1334_v24 }
 0x3a3   :  { %v2567_v33 = vadd.f32 %v2422_v53, %v1229_v30  ;;  %v2018_v35 = vpop.f32.mrb[54].mxu1 }
 0x3a4   :  { %v2844_v38 = vmax.f32 %v2564_v29, 0.0  ;;  %v2574_v40 = vadd.f32 %v2018_v35, %v2422_v53  ;;  %v1232_v42 = vpop.f32.mrb[55].mxu1 }
 0x3a5   :  { %v2580_v46 = vadd.f32 %v2422_v53, %v1232_v42  ;;  %1379 = vadd.xlane.f32.xlu0 %v1331_v37  ;;  %v2842_v54 = vmax.f32 %v2567_v33, 0.0 }
 0x3a6   :  { %v2855_v47 = vmax.f32 %v2574_v40, 0.0  ;;  %1381 = vadd.xlane.f32.xlu1 %v1332_v43  ;;  %v1337_v50 = vmul.f32 %v2433_v58, %v2844_v38  ;;  %v2860_v39 = vmax.f32 %v2574_v40, 0.0  ;;  %v2863_v40 = vmax.f32 %v2539_v1, 0.0 }
 0x3a7   :  { %v2848_v3 = vmax.f32 %v2580_v46, 0.0  ;;  %v1335_v24 = vmul.f32 %v2433_v58, %v2842_v54  ;;  %v2862_v41 = vmax.f32 %v2580_v46, 0.0  ;;  %v2865_v46 = vmax.f32 %v2564_v29, 0.0 }
 0x3a8   :  { %v1338_v61 = vmul.f32 %v2433_v58, %v2855_v47 }
 0x3a9   :  { %v2021_v4 = vpop.f32.mrb[56].mxu1  ;;  %1391 = vadd.xlane.f32.xlu0 %v1337_v50  ;;  %v1336_v37 = vmul.f32 %v2433_v58, %v2848_v3 }
 0x3aa   :  { %v2592_v5 = vadd.f32 %v2021_v4, %v2422_v53  ;;  %v1245_v9 = vpop.f32.mrb[57].mxu1  ;;  %1393 = vadd.xlane.f32.xlu1 %v1338_v61 }
 0x3ab   :  { %v2595_v10 = vadd.f32 %v2422_v53, %v1245_v9  ;;  %v2022_v19 = vpop.f32.mrb[58].mxu1 }
 0x3ac   :  { %v2843_v25 = vmax.f32 %v2592_v5, 0.0  ;;  %v2602_v30 = vadd.f32 %v2022_v19, %v2422_v53  ;;  %v1248_v35 = vpop.f32.mrb[59].mxu1  ;;  %v2868_v29 = vmax.f32 %v2592_v5, 0.0 }
 0x3ad   :  { %v2608_v42 = vadd.f32 %v2422_v53, %v1248_v35  ;;  %1387 = vadd.xlane.f32.xlu0 %v1335_v24  ;;  %v2847_v61 = vmax.f32 %v2595_v10, 0.0 }
 0x3ae   :  { %v2846_v43 = vmax.f32 %v2602_v30, 0.0  ;;  %1389 = vadd.xlane.f32.xlu1 %v1336_v37  ;;  %v1341_v50 = vmul.f32 %v2433_v58, %v2843_v25  ;;  %v2864_v57 = vmax.f32 %v2602_v30, 0.0  ;;  %v2867_v30 = vmax.f32 %v2567_v33, 0.0 }
 0x3af   :  { %v2850_v4 = vmax.f32 %v2608_v42, 0.0  ;;  %v1339_v25 = vmul.f32 %v2433_v58, %v2847_v61  ;;  %v2866_v1 = vmax.f32 %v2608_v42, 0.0  ;;  %v2870_v33 = vmax.f32 %v2595_v10, 0.0 }
 0x3b0   :  { %v1342_v9 = vmul.f32 %v2433_v58, %v2846_v43 }
 0x3b1   :  { %v2025_v19 = vpop.f32.mrb[60].mxu1  ;;  %1399 = vadd.xlane.f32.xlu0 %v1341_v50  ;;  %v1340_v50 = vmul.f32 %v2433_v58, %v2850_v4 }
 0x3b2   :  { %v2620_v35 = vadd.f32 %v2025_v19, %v2422_v53  ;;  %v1261_v24 = vpop.f32.mrb[61].mxu1  ;;  %1401 = vadd.xlane.f32.xlu1 %v1342_v9 }
 0x3b3   :  { %v2623_v37 = vadd.f32 %v2422_v53, %v1261_v24  ;;  %v2026_v54 = vpop.f32.mrb[62].mxu1 }
 0x3b4   :  { %v2849_v38 = vmax.f32 %v2620_v35, 0.0  ;;  %v2630_v20 = vadd.f32 %v2026_v54, %v2422_v53  ;;  %v1264_v43 = vpop.f32.mrb[63].mxu1 }
 0x3b5   :  { %v2636_v9 = vadd.f32 %v2422_v53, %v1264_v43  ;;  %1395 = vadd.xlane.f32.xlu0 %v1339_v25  ;;  %v2852_v61 = vmax.f32 %v2623_v37, 0.0  ;;  %v2653_v43 = vld [vmem:[#allocation2] ss:$0 sm:$0xff] }
 0x3b6   :  { %v2851_v19 = vmax.f32 %v2630_v20, 0.0  ;;  %1397 = vadd.xlane.f32.xlu1 %v1340_v50  ;;  %v1345_v24 = vmul.f32 %v2433_v58, %v2849_v38  ;;  %v2871_v5 = vmax.f32 %v2630_v20, 0.0 }
 0x3b7   :  { %v2854_v54 = vmax.f32 %v2636_v9, 0.0  ;;  %v1343_v53 = vmul.f32 %v2433_v58, %v2852_v61  ;;  %v2869_v42 = vmax.f32 %v2636_v9, 0.0  ;;  %v2872_v9 = vmax.f32 %v2623_v37, 0.0 }
 0x3b8   :  { %v1346_v3 = vmul.f32 %v2433_v58, %v2851_v19 }
 0x3b9   :  { %1407 = vadd.xlane.f32.xlu0 %v1345_v24  ;;  %v1344_v25 = vmul.f32 %v2433_v58, %v2854_v54 }
 0x3ba   :  { %1409 = vadd.xlane.f32.xlu1 %v1346_v3 }
 0x3bd   :  { %1403 = vadd.xlane.f32.xlu0 %v1343_v53 }
 0x3be   :  { %1405 = vadd.xlane.f32.xlu1 %v1344_v25 }
 0x40d   :  { %v1352_v50 = vpop.xlane.xlu1 %1351 }
 0x40e   :  { %v1420_v38 = vadd.f32 %v2653_v43, %v1352_v50  ;;  %v1348_v4 = vpop.xlane.xlu0 %1347 }
 0x40f   :  { %v1418_v19 = vadd.f32 %v2653_v43, %v1348_v4 }
 0x410   :  { %1465 = vperm.xlu1 %2031, %v1420_v38  }
 0x411   :  { %v1354_v3 = vpop.xlane.xlu1 %1353  ;;  %1455 = vperm.xlu0 %2032, %v1418_v19  }
 0x412   :  { %v1421_v24 = vadd.f32 %v2653_v43, %v1354_v3  ;;  %v1350_v61 = vpop.xlane.xlu0 %1349 }
 0x413   :  { %v1419_v7 = vadd.f32 %v2653_v43, %v1350_v61 }
 0x414   :  { %1470 = vperm.xlu1 %2031, %v1421_v24  }
 0x416   :  { %v1360_v58 = vpop.xlane.xlu0 %1359 }
 0x417   :  { %v1362_v53 = vpop.xlane.xlu1 %1361  ;;  %v1424_v25 = vadd.f32 %v2653_v43, %v1360_v58 }
 0x418   :  { %1460 = vperm.xlu1 %2031, %v1419_v7   ;;  %v1425_v3 = vadd.f32 %v2653_v43, %v1362_v53 }
 0x41a   :  { %v1356_v54 = vpop.xlane.xlu0 %1355 }
 0x41b   :  { %v1358_v47 = vpop.xlane.xlu1 %1357  ;;  %v1422_v50 = vadd.f32 %v2653_v43, %v1356_v54 }
 0x41c   :  { %1485 = vperm.xlu1 %2031, %v1424_v25   ;;  %v1423_v7 = vadd.f32 %v2653_v43, %v1358_v47 }
 0x41e   :  { %v1368_v4 = vpop.xlane.xlu0 %1367 }
 0x41f   :  { %v1370_v38 = vpop.xlane.xlu1 %1369  ;;  %v1428_v22 = vadd.f32 %v2653_v43, %v1368_v4 }
 0x420   :  { %v1429_v19 = vadd.f32 %v2653_v43, %v1370_v38  ;;  %1475 = vperm.xlu1 %2031, %v1422_v50  }
 0x422   :  { %1510 = vperm.xlu0 %2032, %v1429_v19   ;;  %v1364_v24 = vpop.xlane.xlu0 %1363 }
 0x423   :  { %v1366_v61 = vpop.xlane.xlu1 %1365  ;;  %v1426_v19 = vadd.f32 %v2653_v43, %v1364_v24 }
 0x424   :  { %v1427_v51 = vadd.f32 %v2653_v43, %v1366_v61  ;;  %1490 = vperm.xlu1 %2031, %v1425_v3  }
 0x426   :  { %1500 = vperm.xlu0 %2032, %v1427_v51   ;;  %v1376_v58 = vpop.xlane.xlu0 %1375 }
 0x427   :  { %v1378_v25 = vpop.xlane.xlu1 %1377  ;;  %v1432_v47 = vadd.f32 %v2653_v43, %v1376_v58 }
 0x428   :  { %v1433_v54 = vadd.f32 %v2653_v43, %v1378_v25  ;;  %1480 = vperm.xlu1 %2031, %v1423_v7  }
 0x42a   :  { %1530 = vperm.xlu0 %2032, %v1433_v54   ;;  %v1372_v50 = vpop.xlane.xlu0 %1371 }
 0x42b   :  { %v1374_v38 = vpop.xlane.xlu1 %1373  ;;  %v1430_v54 = vadd.f32 %v2653_v43, %v1372_v50 }
 0x42c   :  { %v1431_v53 = vadd.f32 %v2653_v43, %v1374_v38  ;;  %1505 = vperm.xlu1 %2031, %v1428_v22  }
 0x42e   :  { %1520 = vperm.xlu0 %2032, %v1431_v53   ;;  %v1384_v3 = vpop.xlane.xlu0 %1383 }
 0x42f   :  { %v1386_v61 = vpop.xlane.xlu1 %1385  ;;  %v1436_v53 = vadd.f32 %v2653_v43, %v1384_v3 }
 0x430   :  { %v1437_v51 = vadd.f32 %v2653_v43, %v1386_v61  ;;  %1495 = vperm.xlu1 %2031, %v1426_v19  }
 0x432   :  { %1550 = vperm.xlu0 %2032, %v1437_v51   ;;  %v1380_v7 = vpop.xlane.xlu0 %1379 }
 0x433   :  { %v1382_v25 = vpop.xlane.xlu1 %1381  ;;  %v1434_v51 = vadd.f32 %v2653_v43, %v1380_v7 }
 0x434   :  { %v1435_v4 = vadd.f32 %v2653_v43, %v1382_v25  ;;  %1525 = vperm.xlu1 %2031, %v1432_v47  }
 0x436   :  { %1540 = vperm.xlu0 %2032, %v1435_v4   ;;  %v1392_v22 = vpop.xlane.xlu0 %1391 }
 0x437   :  { %v1394_v38 = vpop.xlane.xlu1 %1393  ;;  %v1440_v4 = vadd.f32 %v2653_v43, %v1392_v22 }
 0x438   :  { %v1441_v24 = vadd.f32 %v2653_v43, %v1394_v38  ;;  %1515 = vperm.xlu1 %2031, %v1430_v54  }
 0x43a   :  { %1570 = vperm.xlu0 %2032, %v1441_v24   ;;  %v1388_v19 = vpop.xlane.xlu0 %1387 }
 0x43b   :  { %v1390_v61 = vpop.xlane.xlu1 %1389  ;;  %v1438_v24 = vadd.f32 %v2653_v43, %v1388_v19 }
 0x43c   :  { %v1439_v58 = vadd.f32 %v2653_v43, %v1390_v61  ;;  %1545 = vperm.xlu1 %2031, %v1436_v53  }
 0x43e   :  { %1560 = vperm.xlu0 %2032, %v1439_v58   ;;  %v1400_v47 = vpop.xlane.xlu0 %1399 }
 0x43f   :  { %v1402_v25 = vpop.xlane.xlu1 %1401  ;;  %v1444_v61 = vadd.f32 %v2653_v43, %v1400_v47 }
 0x440   :  { %v1445_v50 = vadd.f32 %v2653_v43, %v1402_v25  ;;  %1535 = vperm.xlu1 %2031, %v1434_v51  }
 0x442   :  { %1590 = vperm.xlu0 %2032, %v1445_v50   ;;  %v1396_v54 = vpop.xlane.xlu0 %1395 }
 0x443   :  { %v1398_v38 = vpop.xlane.xlu1 %1397  ;;  %v1442_v22 = vadd.f32 %v2653_v43, %v1396_v54 }
 0x444   :  { %v1443_v3 = vadd.f32 %v2653_v43, %v1398_v38  ;;  %1565 = vperm.xlu1 %2031, %v1440_v4   ;;  %v1450_v38 = vlaneseq }
 0x446   :  { %1580 = vperm.xlu0 %2032, %v1443_v3   ;;  %v1408_v7 = vpop.xlane.xlu0 %1407  ;;  %v2687_v47 = vand.u32 127, %v1450_v38 }
 0x447   :  { %v1410_v53 = vpop.xlane.xlu1 %1409  ;;  %v1448_v19 = vadd.f32 %v2653_v43, %v1408_v7 }
 0x448   :  { %1555 = vperm.xlu1 %2031, %v1438_v24   ;;  %v1449_v50 = vadd.f32 %v2653_v43, %v1410_v53  ;;  %vm1452_vm2 = vcmp.eq.s32.totalorder %v2687_v47, 16 }
 0x44a   :  { %v1404_v51 = vpop.xlane.xlu0 %1403 }
 0x44b   :  { %v1406_v58 = vpop.xlane.xlu1 %1405  ;;  %v1446_v4 = vadd.f32 %v2653_v43, %v1404_v51 }
 0x44c   :  { %v1447_v25 = vadd.f32 %v2653_v43, %v1406_v58  ;;  %1585 = vperm.xlu1 %2031, %v1444_v61  }
 0x44e   :  { %1600 = vperm.xlu0 %2032, %v1447_v25  }
 0x450   :  { %1575 = vperm.xlu1 %2031, %v1442_v22  }
 0x452   :  { %1610 = vperm.xlu0 %2032, %v1449_v50  }
 0x454   :  { %1595 = vperm.xlu1 %2031, %v1446_v4  }
 0x458   :  { %1605 = vperm.xlu1 %2031, %v1448_v19  }
 0x48f   :  { %v1466_v3 = vpop.permute.xlu1 %1465 }
 0x490   :  { %v1615_v54 = vsel %vm1452_vm2, %v1466_v3, %v1278_v59  ;;  %v1456_v24 = vpop.permute.xlu0 %1455 }
 0x491   :  { %1647 = vst [vmem:[#allocation3 + $0x10] sm:$0xff] %v1615_v54  ;;  %v1613_v53 = vsel %vm1452_vm2, %v1456_v24, %v1276_v62 }
 0x492   :  { %1645 = vst [vmem:[#allocation3] sm:$0xff] %v1613_v53 }
 0x493   :  { %v1471_v43 = vpop.permute.xlu1 %1470 }
 0x494   :  { %v1616_v7 = vsel %vm1452_vm2, %v1471_v43, %v1279_v0 }
 0x495   :  { %1648 = vst [vmem:[#allocation3 + $0x18] sm:$0xff] %v1616_v7 }
 0x497   :  { %v1461_v61 = vpop.permute.xlu1 %1460 }
 0x498   :  { %v1614_v55 = vsel %vm1452_vm2, %v1461_v61, %v1277_v2 }
 0x499   :  { %1646 = vst [vmem:[#allocation3 + $0x8] sm:$0xff] %v1614_v55 }
 0x49b   :  { %v1486_v59 = vpop.permute.xlu1 %1485 }
 0x49c   :  { %v1619_v56 = vsel %vm1452_vm2, %v1486_v59, %v1282_v11 }
 0x49d   :  { %1651 = vst [vmem:[#allocation3 + $0x30] sm:$0xff] %v1619_v56 }
 0x49f   :  { %v1476_v62 = vpop.permute.xlu1 %1475 }
 0x4a0   :  { %v1617_v60 = vsel %vm1452_vm2, %v1476_v62, %v1280_v17 }
 0x4a1   :  { %1649 = vst [vmem:[#allocation3 + $0x20] sm:$0xff] %v1617_v60  ;;  %v1511_v0 = vpop.permute.xlu0 %1510 }
 0x4a2   :  { %v1624_v63 = vsel %vm1452_vm2, %v1511_v0, %v1287_v32 }
 0x4a3   :  { %1656 = vst [vmem:[#allocation3 + $0x58] sm:$0xff] %v1624_v63  ;;  %v1491_v2 = vpop.permute.xlu1 %1490 }
 0x4a4   :  { %v1620_v6 = vsel %vm1452_vm2, %v1491_v2, %v1283_v27 }
 0x4a5   :  { %1652 = vst [vmem:[#allocation3 + $0x38] sm:$0xff] %v1620_v6  ;;  %v1501_v11 = vpop.permute.xlu0 %1500 }
 0x4a6   :  { %v1622_v8 = vsel %vm1452_vm2, %v1501_v11, %v1285_v36 }
 0x4a7   :  { %1654 = vst [vmem:[#allocation3 + $0x48] sm:$0xff] %v1622_v8  ;;  %v1481_v17 = vpop.permute.xlu1 %1480 }
 0x4a8   :  { %v1618_v28 = vsel %vm1452_vm2, %v1481_v17, %v1281_v18  ;;  %v2873_v17 = vmax.f32 %v2620_v35, 0.0 }
 0x4a9   :  { %1650 = vst [vmem:[#allocation3 + $0x28] sm:$0xff] %v1618_v28  ;;  %v1531_v32 = vpop.permute.xlu0 %1530 }
 0x4aa   :  { %v1628_v12 = vsel %vm1452_vm2, %v1531_v32, %v1291_v49 }
 0x4ab   :  { %1660 = vst [vmem:[#allocation3 + $0x78] sm:$0xff] %v1628_v12  ;;  %v1506_v27 = vpop.permute.xlu1 %1505 }
 0x4ac   :  { %v1623_v31 = vsel %vm1452_vm2, %v1506_v27, %v1286_v26 }
 0x4ad   :  { %1655 = vst [vmem:[#allocation3 + $0x50] sm:$0xff] %v1623_v31  ;;  %v1521_v36 = vpop.permute.xlu0 %1520 }
 0x4ae   :  { %v1626_v14 = vsel %vm1452_vm2, %v1521_v36, %v1289_v52 }
 0x4af   :  { %1658 = vst [vmem:[#allocation3 + $0x68] sm:$0xff] %v1626_v14  ;;  %v1496_v18 = vpop.permute.xlu1 %1495 }
 0x4b0   :  { %v1621_v45 = vsel %vm1452_vm2, %v1496_v18, %v1284_v34 }
 0x4b1   :  { %1653 = vst [vmem:[#allocation3 + $0x40] sm:$0xff] %v1621_v45  ;;  %v1551_v49 = vpop.permute.xlu0 %1550 }
 0x4b2   :  { %v1632_v21 = vsel %vm1452_vm2, %v1551_v49, %v1295_v15 }
 0x4b3   :  { %1664 = vst [vmem:[#allocation3 + $0x98] sm:$0xff] %v1632_v21  ;;  %v1526_v26 = vpop.permute.xlu1 %1525 }
 0x4b4   :  { %v1627_v48 = vsel %vm1452_vm2, %v1526_v26, %v1290_v44 }
 0x4b5   :  { %1659 = vst [vmem:[#allocation3 + $0x70] sm:$0xff] %v1627_v48  ;;  %v1541_v52 = vpop.permute.xlu0 %1540 }
 0x4b6   :  { %v1630_v34 = vsel %vm1452_vm2, %v1541_v52, %v2858_v23 }
 0x4b7   :  { %1662 = vst [vmem:[#allocation3 + $0x88] sm:$0xff] %v1630_v34  ;;  %v1516_v58 = vpop.permute.xlu1 %1515 }
 0x4b8   :  { %v1625_v15 = vsel %vm1452_vm2, %v1516_v58, %v2859_v16 }
 0x4b9   :  { %1657 = vst [vmem:[#allocation3 + $0x60] sm:$0xff] %v1625_v15  ;;  %v1571_v25 = vpop.permute.xlu0 %1570 }
 0x4ba   :  { %v1636_v44 = vsel %vm1452_vm2, %v1571_v25, %v2860_v39 }
 0x4bb   :  { %1668 = vst [vmem:[#allocation3 + $0xb8] sm:$0xff] %v1636_v44  ;;  %v1546_v22 = vpop.permute.xlu1 %1545 }
 0x4bc   :  { %v1631_v51 = vsel %vm1452_vm2, %v1546_v22, %v2861_v13 }
 0x4bd   :  { %1663 = vst [vmem:[#allocation3 + $0x90] sm:$0xff] %v1631_v51  ;;  %v1561_v50 = vpop.permute.xlu0 %1560 }
 0x4be   :  { %v1634_v4 = vsel %vm1452_vm2, %v1561_v50, %v2862_v41 }
 0x4bf   :  { %1666 = vst [vmem:[#allocation3 + $0xa8] sm:$0xff] %v1634_v4  ;;  %v1536_v19 = vpop.permute.xlu1 %1535 }
 0x4c0   :  { %v1629_v38 = vsel %vm1452_vm2, %v1536_v19, %v2863_v40 }
 0x4c1   :  { %1661 = vst [vmem:[#allocation3 + $0x80] sm:$0xff] %v1629_v38  ;;  %v1591_v3 = vpop.permute.xlu0 %1590 }
 0x4c2   :  { %v1640_v54 = vsel %vm1452_vm2, %v1591_v3, %v2864_v57 }
 0x4c3   :  { %1672 = vst [vmem:[#allocation3 + $0xd8] sm:$0xff] %v1640_v54  ;;  %v1566_v24 = vpop.permute.xlu1 %1565 }
 0x4c4   :  { %v1635_v53 = vsel %vm1452_vm2, %v1566_v24, %v2865_v46 }
 0x4c5   :  { %1667 = vst [vmem:[#allocation3 + $0xb0] sm:$0xff] %v1635_v53  ;;  %v1581_v43 = vpop.permute.xlu0 %1580 }
 0x4c6   :  { %v1638_v7 = vsel %vm1452_vm2, %v1581_v43, %v2866_v1 }
 0x4c7   :  { %1670 = vst [vmem:[#allocation3 + $0xc8] sm:$0xff] %v1638_v7  ;;  %v1556_v61 = vpop.permute.xlu1 %1555 }
 0x4c8   :  { %v1633_v55 = vsel %vm1452_vm2, %v1556_v61, %v2867_v30 }
 0x4c9   :  { %1665 = vst [vmem:[#allocation3 + $0xa0] sm:$0xff] %v1633_v55 }
 0x4cb   :  { %v1586_v59 = vpop.permute.xlu1 %1585 }
 0x4cc   :  { %v1639_v56 = vsel %vm1452_vm2, %v1586_v59, %v2868_v29 }
 0x4cd   :  { %1671 = vst [vmem:[#allocation3 + $0xd0] sm:$0xff] %v1639_v56  ;;  %v1601_v62 = vpop.permute.xlu0 %1600 }
 0x4ce   :  { %v1642_v60 = vsel %vm1452_vm2, %v1601_v62, %v2869_v42 }
 0x4cf   :  { %1674 = vst [vmem:[#allocation3 + $0xe8] sm:$0xff] %v1642_v60  ;;  %v1576_v0 = vpop.permute.xlu1 %1575 }
 0x4d0   :  { %v1637_v63 = vsel %vm1452_vm2, %v1576_v0, %v2870_v33 }
 0x4d1   :  { %1669 = vst [vmem:[#allocation3 + $0xc0] sm:$0xff] %v1637_v63  ;;  %v1611_v2 = vpop.permute.xlu0 %1610 }
 0x4d2   :  { %v1644_v6 = vsel %vm1452_vm2, %v1611_v2, %v2871_v5 }
 0x4d3   :  { %1676 = vst [vmem:[#allocation3 + $0xf8] sm:$0xff] %v1644_v6  ;;  %v1596_v11 = vpop.permute.xlu1 %1595 }
 0x4d4   :  { %v1641_v8 = vsel %vm1452_vm2, %v1596_v11, %v2872_v9 }
 0x4d5   :  { %1673 = vst [vmem:[#allocation3 + $0xe0] sm:$0xff] %v1641_v8 }
 0x4d7   :  { %v1606_v10 = vpop.permute.xlu1 %1605 }
 0x4d8   :  { %v1643_v20 = vsel %vm1452_vm2, %v1606_v10, %v2873_v17 }
 0x4d9   :  { %1675 = vst [vmem:[#allocation3 + $0xf0] sm:$0xff] %v1643_v20 }
 0x4da   :  { %2074 = shalt.err (!%p2071_p4)
}
 0x4db   :  { %s2075_s22 = scalar_lea.hbm %s2841_s11, 4096 }
 0x4dc   :  { %p2076_p5 = scmp.ne.s32.totalorder %s2841_s11, %s2075_s22  ;;  %p2079_p6 = scmp.lt.u32.totalorder %s2075_s22, %s2841_s11 }
 0x4de   :  { %p2081_p7 = pnand %p2079_p6, %p2076_p5 }
 0x4e0   :  { %2084 = shalt.err (!%p2081_p7)
}
 0x4e1   :  { %s2089_s3 = smov 128   ;;  %s2090_s25 = smov 8  }
 0x4e2   :  { %1688 = dma.vmem_to_hbm [thread:$0]  %s1683_s9, 4096, %s2841_s11, [#allocation4], %s2089_s3, %s2089_s3, %s2090_s25  }
 0x4e3   :  { %2085 = dma.done.wait [#allocation4], 4096  }
 0x4e4   :  { %2086 = vsyncadd [#allocation4], 4294963200 }
 0x4e5   :  { %1692 = vsyncpa [#allocation4], 1 }

</bundles_post_ra>
